<compile_context>
chip_gen: v5e
topology: v5e:2x2
jax: 0.10.0
libtpu: 0.0.40
codegen_flags: <defaults>
</compile_context>

<pallas_src>
import functools

import jax
import jax.numpy as jnp
from jax import lax
from jax.experimental import pallas as pl
from jax.experimental.pallas import tpu as pltpu


# --------------------------------------------------------------------------------------
# Fused kernel: Q/K/V projections + multi-head attention + output projection, per batch.
# --------------------------------------------------------------------------------------
def _mha_kernel(q_ref, k_ref, v_ref, m_ref,
                wq_ref, bq_ref, wk_ref, bk_ref, wv_ref, bv_ref, wo_ref, bo_ref,
                o_ref, kscr, vscr, merged_ref, *,
                heads, head_dim, q_dim, v_dim, v_len, scale, mask_heads):
    # q_ref : (1, QL, QD*E)   raw query rows for this batch element
    # k_ref : (1, VL, VD*E)   raw key rows
    # v_ref : (1, VL, VD*E)   raw value rows
    # m_ref : (1, mh, QD, QL, Sk)  additive mask bias (0 / -1e20*scale), Sk vd-major
    # w*_t  : pre-transposed nn.Linear weights, VMEM-resident across the grid
    # o_ref : (1, QL, QD*E)   lane-dense output block (last dim multiple of 128)
    # kscr/vscr : (Sk, H*HD)  f32 VMEM scratch — projected K/V in head-major columns
    # merged_ref: (QL, QD*E)  f32 VMEM scratch — merged head outputs
    HD = head_dim
    E = heads * HD
    VL = v_len

    # ---- input projections: x @ W^T + b (weights already transposed in wrapper) ----
    qp = jnp.dot(q_ref[0], wq_ref[...], preferred_element_type=jnp.float32) + bq_ref[...]
    qp = qp * jnp.float32(scale)          # fold 1/sqrt(embedSize) into Q before QK^T
    kp = jnp.dot(k_ref[0], wk_ref[...], preferred_element_type=jnp.float32) + bk_ref[...]
    vp = jnp.dot(v_ref[0], wv_ref[...], preferred_element_type=jnp.float32) + bv_ref[...]

    # ---- relayout projected K/V into (Sk, H*HD); Sk flattened vd-major to match mask ----
    for vd in range(v_dim):
        kscr[vd * VL:(vd + 1) * VL, :] = kp[:, vd * E:(vd + 1) * E]
        vscr[vd * VL:(vd + 1) * VL, :] = vp[:, vd * E:(vd + 1) * E]

    # ---- all-heads attention, fully VMEM resident ----
    for h in range(heads):
        k_h = kscr[:, h * HD:(h + 1) * HD]                              # (Sk, HD)
        v_h = vscr[:, h * HD:(h + 1) * HD]                              # (Sk, HD)
        for qd in range(q_dim):
            col = (qd * heads + h) * HD     # column block in the (QL, QD*H*HD) layout
            q_b = qp[:, col:col + HD]                                   # (QL, HD)
            s = lax.dot_general(q_b, k_h, (((1,), (1,)), ((), ())),
                                preferred_element_type=jnp.float32)     # (QL, Sk)
            s = s + m_ref[0, h % mask_heads, qd]        # additive masked_fill (pre-scaled)
            # numerically-stable softmax over the flattened (valueLen*valueDim) axis
            s = s - jnp.max(s, axis=-1, keepdims=True)
            p = jnp.exp(s)
            l = jnp.sum(p, axis=-1, keepdims=True)                      # (QL, 1)
            pv = jnp.dot(p, v_h, preferred_element_type=jnp.float32)    # (QL, HD)
            # normalise after PV (QL*HD elems, not QL*Sk); reciprocal runs on the EUP
            merged_ref[:, col:col + HD] = pv * pl.reciprocal(l, approx=True)

    out = jnp.dot(merged_ref[...], wo_ref[...],
                  preferred_element_type=jnp.float32) + bo_ref[...]
    o_ref[0] = out.astype(o_ref.dtype)


# --------------------------------------------------------------------------------------
# Wrapper
# --------------------------------------------------------------------------------------
def _prepare_mask_bias(mask, N, heads, QL, QD, VL, VD, fill):
    """Compact additive bias in (N, mh, QD, QL, VD*VL) layout (vd-major key flattening,
    matching the kernel's K/V scratch ordering).  mh stays 1 for head-invariant masks."""
    Sk = VL * VD
    if mask is None:
        return jnp.zeros((N, 1, QD, QL, Sk), jnp.float32)
    m = jnp.asarray(mask)
    while m.ndim < 6:                  # torch masked_fill broadcasting is right-aligned
        m = m[None]
    mh = m.shape[1] if m.shape[1] == heads else 1
    m = jnp.broadcast_to(m, (N, mh, QL, QD, VL, VD))
    m = m.transpose(0, 1, 3, 2, 5, 4).reshape(N, mh, QD, QL, VD * VL)
    return jnp.where(m == 0, jnp.float32(fill), jnp.float32(0.0))


def multi_head_attention_pallas(params, query, key, value, mask, *, heads, head_dim,
                                embed_size):
    N, QL, QD, E = query.shape
    _, VL, VD, _ = value.shape
    H, HD = heads, head_dim
    assert H * HD == embed_size == E, "heads*headDim must equal embedSize"
    DqE, DvE = QD * E, VD * E
    Sk = VL * VD
    scale = 1.0 / (float(embed_size) ** 0.5)

    # pre-transpose nn.Linear weights once so the kernel contracts W's leading dim
    wq_t, wk_t = params["wq"].T, params["wk"].T
    wv_t, wo_t = params["wv"].T, params["wo"].T
    bq = params["bq"].reshape(1, DqE)
    bk = params["bk"].reshape(1, DvE)
    bv = params["bv"].reshape(1, DvE)
    bo = params["bo"].reshape(1, DqE)

    # contiguous (free) reshapes only — no transposes anywhere in the wrapper
    q_in = query.reshape(N, QL, DqE)
    k_in = key.reshape(N, VL, DvE)
    v_in = value.reshape(N, VL, DvE)

    # masked_fill(-1e20) happens BEFORE the scale in the torch module; with the scale
    # folded into Q, the equivalent additive bias is -1e20 * scale (identical softmax).
    mask_bias = _prepare_mask_bias(mask, N, H, QL, QD, VL, VD, fill=-1e20 * scale)
    mh = mask_bias.shape[1]

    out = pl.pallas_call(
        functools.partial(_mha_kernel, heads=H, head_dim=HD, q_dim=QD, v_dim=VD,
                          v_len=VL, scale=scale, mask_heads=mh),
        grid=(N,),
        out_shape=jax.ShapeDtypeStruct((N, QL, DqE), query.dtype),
        in_specs=[
            pl.BlockSpec((1, QL, DqE), lambda n: (n, 0, 0)),
            pl.BlockSpec((1, VL, DvE), lambda n: (n, 0, 0)),
            pl.BlockSpec((1, VL, DvE), lambda n: (n, 0, 0)),
            pl.BlockSpec((1, mh, QD, QL, Sk), lambda n: (n, 0, 0, 0, 0)),
            pl.BlockSpec((DqE, DqE), lambda n: (0, 0)),   # weights stay VMEM-resident
            pl.BlockSpec((1, DqE), lambda n: (0, 0)),
            pl.BlockSpec((DvE, DvE), lambda n: (0, 0)),
            pl.BlockSpec((1, DvE), lambda n: (0, 0)),
            pl.BlockSpec((DvE, DvE), lambda n: (0, 0)),
            pl.BlockSpec((1, DvE), lambda n: (0, 0)),
            pl.BlockSpec((DqE, DqE), lambda n: (0, 0)),
            pl.BlockSpec((1, DqE), lambda n: (0, 0)),
        ],
        out_specs=pl.BlockSpec((1, QL, DqE), lambda n: (n, 0, 0)),
        scratch_shapes=[pltpu.VMEM((Sk, E), jnp.float32),      # projected K (head-major)
                        pltpu.VMEM((Sk, E), jnp.float32),      # projected V (head-major)
                        pltpu.VMEM((QL, DqE), jnp.float32)],   # merged head outputs
        compiler_params=pltpu.CompilerParams(dimension_semantics=("parallel",)),
    )(q_in, k_in, v_in, mask_bias, wq_t, bq, wk_t, bk, wv_t, bv, wo_t, bo)

    return out.reshape(N, QL, QD, E)


# --------------------------------------------------------------------------------------
# Pure-JAX reference (mirrors the PyTorch forward verbatim) for verification
# --------------------------------------------------------------------------------------
def multi_head_attention_ref(params, query, key, value, mask, *, heads, head_dim,
                             embed_size):
    N, QL, QD, E = query.shape
    _, VL, VD, _ = value.shape
    H, HD = heads, head_dim

    def lin(x, w, b):
        return x @ w.T + b

    v = lin(value.reshape(N, VL, VD * E), params["wv"], params["bv"])
    k = lin(key.reshape(N, VL, VD * E), params["wk"], params["bk"])
    q = lin(query.reshape(N, QL, QD * E), params["wq"], params["bq"])

    v = v.reshape(N, VL, VD, H, HD)
    k = k.reshape(N, VL, VD, H, HD)
    q = q.reshape(N, QL, QD, H, HD)

    energy = jnp.einsum("nqxhd,nkyhd->nhqxky", q, k)
    if mask is not None:
        energy = jnp.where(jnp.broadcast_to(mask, energy.shape) == 0,
                           jnp.float32(-1e20), energy)
    energy = energy.reshape(N, H, QL, QD, -1)
    attention = jax.nn.softmax(energy / (float(embed_size) ** 0.5), axis=4)
    attention = attention.reshape(N, H, QL, QD, VL, VD)
    out = jnp.einsum("nhqxvy,nvyhd->nqxhd", attention, v).reshape(N, QL, QD, H * HD)
    out = lin(out.reshape(N, QL, -1), params["wo"], params["bo"])
    return out.reshape(N, QL, QD, E)


# --------------------------------------------------------------------------------------
# Main
# --------------------------------------------------------------------------------------
if __name__ == "__main__":
    # transformerInfo: embedSize=32, heads=4, headDim=8 (heads*headDim == embedSize)
    N, QL, VL = 2, 8, 8
    QD, VD = 4, 4
    E, H, HD = 32, 4, 8

    key0 = jax.random.PRNGKey(0)
    ks = jax.random.split(key0, 12)

    def init_linear(kw, kb, dim):
        w = jax.random.normal(kw, (dim, dim), jnp.float32) * (1.0 / jnp.sqrt(dim))
        b = jax.random.normal(kb, (dim,), jnp.float32) * 0.01
        return w, b

    wv, bv = init_linear(ks[0], ks[1], VD * E)
    wk, bk = init_linear(ks[2], ks[3], VD * E)
    wq, bq = init_linear(ks[4], ks[5], QD * E)
    wo, bo = init_linear(ks[6], ks[7], QD * E)
    params = {"wq": wq, "bq": bq, "wk": wk, "bk": bk,
              "wv": wv, "bv": bv, "wo": wo, "bo": bo}

    query = jax.random.normal(ks[8], (N, QL, QD, E), jnp.float32)
    key_in = jax.random.normal(ks[9], (N, VL, VD, E), jnp.float32)
    value = jax.random.normal(ks[10], (N, VL, VD, E), jnp.float32)
    # broadcastable mask (like the PyTorch masked_fill path); some zeros, deterministic
    mask = (jax.random.uniform(ks[11], (N, 1, 1, 1, VL, VD)) > 0.2).astype(jnp.float32)

    fwd = jax.jit(functools.partial(multi_head_attention_pallas,
                                    heads=H, head_dim=HD, embed_size=E))
    out = jax.block_until_ready(fwd(params, query, key_in, value, mask))

    ref = jax.block_until_ready(
        multi_head_attention_ref(params, query, key_in, value, mask,
                                 heads=H, head_dim=HD, embed_size=E))

    assert out.shape == (N, QL, QD, E), out.shape
    # Tolerance accounts for TPU default-precision MXU passes seeing mathematically
    # identical but differently-ordered ops (scale folded into Q, normalisation moved
    # after PV, approximate reciprocal).  Real layout/indexing bugs produce O(1) errors.
    assert jnp.allclose(out, ref, atol=2e-2, rtol=2e-2), \
        f"max abs err {jnp.max(jnp.abs(out - ref))}"

    print("KERNEL_OK")
</pallas_src>

<mosaic_0001>
module attributes {stable_mosaic.version = 11 : i64} {
  func.func @_mha_kernel(%arg0: i32, %arg1: memref<1x8x128xf32, #tpu.memory_space<vmem>>, %arg2: memref<1x8x128xf32, #tpu.memory_space<vmem>>, %arg3: memref<1x8x128xf32, #tpu.memory_space<vmem>>, %arg4: memref<1x1x4x8x32xf32, #tpu.memory_space<vmem>>, %arg5: memref<128x128xf32, #tpu.memory_space<vmem>>, %arg6: memref<1x128xf32, #tpu.memory_space<vmem>>, %arg7: memref<128x128xf32, #tpu.memory_space<vmem>>, %arg8: memref<1x128xf32, #tpu.memory_space<vmem>>, %arg9: memref<128x128xf32, #tpu.memory_space<vmem>>, %arg10: memref<1x128xf32, #tpu.memory_space<vmem>>, %arg11: memref<128x128xf32, #tpu.memory_space<vmem>>, %arg12: memref<1x128xf32, #tpu.memory_space<vmem>>, %arg13: memref<1x8x128xf32, #tpu.memory_space<vmem>>, %arg14: memref<32x32xf32, #tpu.memory_space<vmem>>, %arg15: memref<32x32xf32, #tpu.memory_space<vmem>>, %arg16: memref<8x128xf32, #tpu.memory_space<vmem>>) attributes {dimension_semantics = [#tpu.dimension_semantics<parallel>], iteration_bounds = array<i64: 2>, scalar_prefetch = 0 : i64, scratch_operands = 3 : i64, tpu.core_type = #tpu.core_type<tc>, window_params = [{transform_indices = @transform_0, window_bounds = array<i64: 1, 8, 128>}, {transform_indices = @transform_1, window_bounds = array<i64: 1, 8, 128>}, {transform_indices = @transform_2, window_bounds = array<i64: 1, 8, 128>}, {transform_indices = @transform_3, window_bounds = array<i64: 1, 1, 4, 8, 32>}, {pipeline_mode = #tpu.pipeline_mode<synchronous>, transform_indices = @transform_4, window_bounds = array<i64: 128, 128>}, {pipeline_mode = #tpu.pipeline_mode<synchronous>, transform_indices = @transform_5, window_bounds = array<i64: 1, 128>}, {pipeline_mode = #tpu.pipeline_mode<synchronous>, transform_indices = @transform_6, window_bounds = array<i64: 128, 128>}, {pipeline_mode = #tpu.pipeline_mode<synchronous>, transform_indices = @transform_7, window_bounds = array<i64: 1, 128>}, {pipeline_mode = #tpu.pipeline_mode<synchronous>, transform_indices = @transform_8, window_bounds = array<i64: 128, 128>}, {pipeline_mode = #tpu.pipeline_mode<synchronous>, transform_indices = @transform_9, window_bounds = array<i64: 1, 128>}, {pipeline_mode = #tpu.pipeline_mode<synchronous>, transform_indices = @transform_10, window_bounds = array<i64: 128, 128>}, {pipeline_mode = #tpu.pipeline_mode<synchronous>, transform_indices = @transform_11, window_bounds = array<i64: 1, 128>}, {transform_indices = @transform_12, window_bounds = array<i64: 1, 8, 128>}]} {
    %c0 = arith.constant 0 : index
    %c0_0 = arith.constant 0 : index
    %c0_1 = arith.constant 0 : index
    %0 = vector.load %arg1[%c0, %c0_0, %c0_1] : memref<1x8x128xf32, #tpu.memory_space<vmem>>, vector<1x8x128xf32>
    %1 = vector.shape_cast %0 : vector<1x8x128xf32> to vector<8x128xf32>
    %c0_2 = arith.constant 0 : index
    %c0_3 = arith.constant 0 : index
    %2 = vector.load %arg5[%c0_2, %c0_3] : memref<128x128xf32, #tpu.memory_space<vmem>>, vector<128x128xf32>
    %cst = arith.constant dense<0.000000e+00> : vector<8x128xf32>
    %3 = tpu.matmul %1, %2, %cst {dimension_numbers = #tpu.dot_dimension_numbers<[1], [0], [0], [1], [0, 0, 1, 1], [], []>} : vector<8x128xf32>, vector<128x128xf32>, vector<8x128xf32> -> vector<8x128xf32>
    %c0_4 = arith.constant 0 : index
    %c0_5 = arith.constant 0 : index
    %4 = vector.load %arg6[%c0_4, %c0_5] : memref<1x128xf32, #tpu.memory_space<vmem>>, vector<1x128xf32>
    %5 = vector.broadcast %4 : vector<1x128xf32> to vector<8x128xf32>
    %6 = arith.addf %3, %5 : vector<8x128xf32>
    %cst_6 = arith.constant 0.176776692 : f32
    %7 = vector.broadcast %cst_6 : f32 to vector<8x128xf32>
    %8 = arith.mulf %6, %7 : vector<8x128xf32>
    %c0_7 = arith.constant 0 : index
    %c0_8 = arith.constant 0 : index
    %c0_9 = arith.constant 0 : index
    %9 = vector.load %arg2[%c0_7, %c0_8, %c0_9] : memref<1x8x128xf32, #tpu.memory_space<vmem>>, vector<1x8x128xf32>
    %10 = vector.shape_cast %9 : vector<1x8x128xf32> to vector<8x128xf32>
    %c0_10 = arith.constant 0 : index
    %c0_11 = arith.constant 0 : index
    %11 = vector.load %arg7[%c0_10, %c0_11] : memref<128x128xf32, #tpu.memory_space<vmem>>, vector<128x128xf32>
    %cst_12 = arith.constant dense<0.000000e+00> : vector<8x128xf32>
    %12 = tpu.matmul %10, %11, %cst_12 {dimension_numbers = #tpu.dot_dimension_numbers<[1], [0], [0], [1], [0, 0, 1, 1], [], []>} : vector<8x128xf32>, vector<128x128xf32>, vector<8x128xf32> -> vector<8x128xf32>
    %c0_13 = arith.constant 0 : index
    %c0_14 = arith.constant 0 : index
    %13 = vector.load %arg8[%c0_13, %c0_14] : memref<1x128xf32, #tpu.memory_space<vmem>>, vector<1x128xf32>
    %14 = vector.broadcast %13 : vector<1x128xf32> to vector<8x128xf32>
    %15 = arith.addf %12, %14 : vector<8x128xf32>
    %c0_15 = arith.constant 0 : index
    %c0_16 = arith.constant 0 : index
    %c0_17 = arith.constant 0 : index
    %16 = vector.load %arg3[%c0_15, %c0_16, %c0_17] : memref<1x8x128xf32, #tpu.memory_space<vmem>>, vector<1x8x128xf32>
    %17 = vector.shape_cast %16 : vector<1x8x128xf32> to vector<8x128xf32>
    %c0_18 = arith.constant 0 : index
    %c0_19 = arith.constant 0 : index
    %18 = vector.load %arg9[%c0_18, %c0_19] : memref<128x128xf32, #tpu.memory_space<vmem>>, vector<128x128xf32>
    %cst_20 = arith.constant dense<0.000000e+00> : vector<8x128xf32>
    %19 = tpu.matmul %17, %18, %cst_20 {dimension_numbers = #tpu.dot_dimension_numbers<[1], [0], [0], [1], [0, 0, 1, 1], [], []>} : vector<8x128xf32>, vector<128x128xf32>, vector<8x128xf32> -> vector<8x128xf32>
    %c0_21 = arith.constant 0 : index
    %c0_22 = arith.constant 0 : index
    %20 = vector.load %arg10[%c0_21, %c0_22] : memref<1x128xf32, #tpu.memory_space<vmem>>, vector<1x128xf32>
    %21 = vector.broadcast %20 : vector<1x128xf32> to vector<8x128xf32>
    %22 = arith.addf %19, %21 : vector<8x128xf32>
    %23 = vector.extract_strided_slice %15 {offsets = [0, 0], sizes = [8, 32], strides = [1, 1]} : vector<8x128xf32> to vector<8x32xf32>
    %c0_23 = arith.constant 0 : index
    %c0_24 = arith.constant 0 : index
    %24 = vector.load %arg14[%c0_23, %c0_24] : memref<32x32xf32, #tpu.memory_space<vmem>>, vector<8x32xf32>
    tpu.vector_store %arg14[%c0_23, %c0_24], %23 {strides = array<i32>} : memref<32x32xf32, #tpu.memory_space<vmem>>, vector<8x32xf32>,
    %25 = vector.extract_strided_slice %22 {offsets = [0, 0], sizes = [8, 32], strides = [1, 1]} : vector<8x128xf32> to vector<8x32xf32>
    %c0_25 = arith.constant 0 : index
    %c0_26 = arith.constant 0 : index
    %26 = vector.load %arg15[%c0_25, %c0_26] : memref<32x32xf32, #tpu.memory_space<vmem>>, vector<8x32xf32>
    tpu.vector_store %arg15[%c0_25, %c0_26], %25 {strides = array<i32>} : memref<32x32xf32, #tpu.memory_space<vmem>>, vector<8x32xf32>,
    %27 = vector.extract_strided_slice %15 {offsets = [0, 32], sizes = [8, 32], strides = [1, 1]} : vector<8x128xf32> to vector<8x32xf32>
    %c8 = arith.constant 8 : index
    %c0_27 = arith.constant 0 : index
    %28 = vector.load %arg14[%c8, %c0_27] : memref<32x32xf32, #tpu.memory_space<vmem>>, vector<8x32xf32>
    tpu.vector_store %arg14[%c8, %c0_27], %27 {strides = array<i32>} : memref<32x32xf32, #tpu.memory_space<vmem>>, vector<8x32xf32>,
    %29 = vector.extract_strided_slice %22 {offsets = [0, 32], sizes = [8, 32], strides = [1, 1]} : vector<8x128xf32> to vector<8x32xf32>
    %c8_28 = arith.constant 8 : index
    %c0_29 = arith.constant 0 : index
    %30 = vector.load %arg15[%c8_28, %c0_29] : memref<32x32xf32, #tpu.memory_space<vmem>>, vector<8x32xf32>
    tpu.vector_store %arg15[%c8_28, %c0_29], %29 {strides = array<i32>} : memref<32x32xf32, #tpu.memory_space<vmem>>, vector<8x32xf32>,
    %31 = vector.extract_strided_slice %15 {offsets = [0, 64], sizes = [8, 32], strides = [1, 1]} : vector<8x128xf32> to vector<8x32xf32>
    %c16 = arith.constant 16 : index
    %c0_30 = arith.constant 0 : index
    %32 = vector.load %arg14[%c16, %c0_30] : memref<32x32xf32, #tpu.memory_space<vmem>>, vector<8x32xf32>
    tpu.vector_store %arg14[%c16, %c0_30], %31 {strides = array<i32>} : memref<32x32xf32, #tpu.memory_space<vmem>>, vector<8x32xf32>,
    %33 = vector.extract_strided_slice %22 {offsets = [0, 64], sizes = [8, 32], strides = [1, 1]} : vector<8x128xf32> to vector<8x32xf32>
    %c16_31 = arith.constant 16 : index
    %c0_32 = arith.constant 0 : index
    %34 = vector.load %arg15[%c16_31, %c0_32] : memref<32x32xf32, #tpu.memory_space<vmem>>, vector<8x32xf32>
    tpu.vector_store %arg15[%c16_31, %c0_32], %33 {strides = array<i32>} : memref<32x32xf32, #tpu.memory_space<vmem>>, vector<8x32xf32>,
    %35 = vector.extract_strided_slice %15 {offsets = [0, 96], sizes = [8, 32], strides = [1, 1]} : vector<8x128xf32> to vector<8x32xf32>
    %c24 = arith.constant 24 : index
    %c0_33 = arith.constant 0 : index
    %36 = vector.load %arg14[%c24, %c0_33] : memref<32x32xf32, #tpu.memory_space<vmem>>, vector<8x32xf32>
    tpu.vector_store %arg14[%c24, %c0_33], %35 {strides = array<i32>} : memref<32x32xf32, #tpu.memory_space<vmem>>, vector<8x32xf32>,
    %37 = vector.extract_strided_slice %22 {offsets = [0, 96], sizes = [8, 32], strides = [1, 1]} : vector<8x128xf32> to vector<8x32xf32>
    %c24_34 = arith.constant 24 : index
    %c0_35 = arith.constant 0 : index
    %38 = vector.load %arg15[%c24_34, %c0_35] : memref<32x32xf32, #tpu.memory_space<vmem>>, vector<8x32xf32>
    tpu.vector_store %arg15[%c24_34, %c0_35], %37 {strides = array<i32>} : memref<32x32xf32, #tpu.memory_space<vmem>>, vector<8x32xf32>,
    %c0_36 = arith.constant 0 : index
    %c0_37 = arith.constant 0 : index
    %39 = vector.load %arg14[%c0_36, %c0_37] : memref<32x32xf32, #tpu.memory_space<vmem>>, vector<32x8xf32>
    %c0_38 = arith.constant 0 : index
    %c0_39 = arith.constant 0 : index
    %40 = vector.load %arg15[%c0_38, %c0_39] : memref<32x32xf32, #tpu.memory_space<vmem>>, vector<32x8xf32>
    %41 = vector.extract_strided_slice %8 {offsets = [0, 0], sizes = [8, 8], strides = [1, 1]} : vector<8x128xf32> to vector<8x8xf32>
    %cst_40 = arith.constant dense<0.000000e+00> : vector<8x32xf32>
    %42 = tpu.matmul %41, %39, %cst_40 {dimension_numbers = #tpu.dot_dimension_numbers<[1], [1], [0], [0], [0, 0, 1, 0], [], []>} : vector<8x8xf32>, vector<32x8xf32>, vector<8x32xf32> -> vector<8x32xf32>
    %c0_41 = arith.constant 0 : index
    %c0_42 = arith.constant 0 : index
    %c0_43 = arith.constant 0 : index
    %c0_44 = arith.constant 0 : index
    %c0_45 = arith.constant 0 : index
    %43 = vector.load %arg4[%c0_41, %c0_42, %c0_43, %c0_44, %c0_45] : memref<1x1x4x8x32xf32, #tpu.memory_space<vmem>>, vector<1x1x1x8x32xf32>
    %44 = vector.shape_cast %43 : vector<1x1x1x8x32xf32> to vector<8x32xf32>
    %45 = arith.addf %42, %44 : vector<8x32xf32>
    %cst_46 = arith.constant dense<0xFF800000> : vector<8xf32>
    %46 = vector.multi_reduction <maximumf>, %45, %cst_46 [1] : vector<8x32xf32> to vector<8xf32>
    %47 = vector.shape_cast %46 : vector<8xf32> to vector<8x1xf32>
    %48 = vector.broadcast %47 : vector<8x1xf32> to vector<8x32xf32>
    %49 = arith.subf %45, %48 : vector<8x32xf32>
    %50 = math.exp %49 : vector<8x32xf32>
    %cst_47 = arith.constant dense<0.000000e+00> : vector<8xf32>
    %51 = vector.multi_reduction <add>, %50, %cst_47 [1] : vector<8x32xf32> to vector<8xf32>
    %52 = vector.shape_cast %51 : vector<8xf32> to vector<8x1xf32>
    %cst_48 = arith.constant dense<0.000000e+00> : vector<8x8xf32>
    %53 = tpu.matmul %50, %40, %cst_48 {dimension_numbers = #tpu.dot_dimension_numbers<[1], [0], [0], [1], [0, 0, 1, 1], [], []>} : vector<8x32xf32>, vector<32x8xf32>, vector<8x8xf32> -> vector<8x8xf32>
    %54 = tpu.reciprocal %52 {approx = true} : vector<8x1xf32> -> vector<8x1xf32>
    %55 = vector.broadcast %54 : vector<8x1xf32> to vector<8x8xf32>
    %56 = arith.mulf %53, %55 : vector<8x8xf32>
    %c0_49 = arith.constant 0 : index
    %c0_50 = arith.constant 0 : index
    %57 = vector.load %arg16[%c0_49, %c0_50] : memref<8x128xf32, #tpu.memory_space<vmem>>, vector<8x8xf32>
    tpu.vector_store %arg16[%c0_49, %c0_50], %56 {strides = array<i32>} : memref<8x128xf32, #tpu.memory_space<vmem>>, vector<8x8xf32>,
    %58 = vector.extract_strided_slice %8 {offsets = [0, 32], sizes = [8, 8], strides = [1, 1]} : vector<8x128xf32> to vector<8x8xf32>
    %cst_51 = arith.constant dense<0.000000e+00> : vector<8x32xf32>
    %59 = tpu.matmul %58, %39, %cst_51 {dimension_numbers = #tpu.dot_dimension_numbers<[1], [1], [0], [0], [0, 0, 1, 0], [], []>} : vector<8x8xf32>, vector<32x8xf32>, vector<8x32xf32> -> vector<8x32xf32>
    %c0_52 = arith.constant 0 : index
    %c0_53 = arith.constant 0 : index
    %c1 = arith.constant 1 : index
    %c0_54 = arith.constant 0 : index
    %c0_55 = arith.constant 0 : index
    %60 = vector.load %arg4[%c0_52, %c0_53, %c1, %c0_54, %c0_55] : memref<1x1x4x8x32xf32, #tpu.memory_space<vmem>>, vector<1x1x1x8x32xf32>
    %61 = vector.shape_cast %60 : vector<1x1x1x8x32xf32> to vector<8x32xf32>
    %62 = arith.addf %59, %61 : vector<8x32xf32>
    %cst_56 = arith.constant dense<0xFF800000> : vector<8xf32>
    %63 = vector.multi_reduction <maximumf>, %62, %cst_56 [1] : vector<8x32xf32> to vector<8xf32>
    %64 = vector.shape_cast %63 : vector<8xf32> to vector<8x1xf32>
    %65 = vector.broadcast %64 : vector<8x1xf32> to vector<8x32xf32>
    %66 = arith.subf %62, %65 : vector<8x32xf32>
    %67 = math.exp %66 : vector<8x32xf32>
    %cst_57 = arith.constant dense<0.000000e+00> : vector<8xf32>
    %68 = vector.multi_reduction <add>, %67, %cst_57 [1] : vector<8x32xf32> to vector<8xf32>
    %69 = vector.shape_cast %68 : vector<8xf32> to vector<8x1xf32>
    %cst_58 = arith.constant dense<0.000000e+00> : vector<8x8xf32>
    %70 = tpu.matmul %67, %40, %cst_58 {dimension_numbers = #tpu.dot_dimension_numbers<[1], [0], [0], [1], [0, 0, 1, 1], [], []>} : vector<8x32xf32>, vector<32x8xf32>, vector<8x8xf32> -> vector<8x8xf32>
    %71 = tpu.reciprocal %69 {approx = true} : vector<8x1xf32> -> vector<8x1xf32>
    %72 = vector.broadcast %71 : vector<8x1xf32> to vector<8x8xf32>
    %73 = arith.mulf %70, %72 : vector<8x8xf32>
    %c0_59 = arith.constant 0 : index
    %c32 = arith.constant 32 : index
    %74 = vector.load %arg16[%c0_59, %c32] : memref<8x128xf32, #tpu.memory_space<vmem>>, vector<8x8xf32>
    tpu.vector_store %arg16[%c0_59, %c32], %73 {strides = array<i32>} : memref<8x128xf32, #tpu.memory_space<vmem>>, vector<8x8xf32>,
    %75 = vector.extract_strided_slice %8 {offsets = [0, 64], sizes = [8, 8], strides = [1, 1]} : vector<8x128xf32> to vector<8x8xf32>
    %cst_60 = arith.constant dense<0.000000e+00> : vector<8x32xf32>
    %76 = tpu.matmul %75, %39, %cst_60 {dimension_numbers = #tpu.dot_dimension_numbers<[1], [1], [0], [0], [0, 0, 1, 0], [], []>} : vector<8x8xf32>, vector<32x8xf32>, vector<8x32xf32> -> vector<8x32xf32>
    %c0_61 = arith.constant 0 : index
    %c0_62 = arith.constant 0 : index
    %c2 = arith.constant 2 : index
    %c0_63 = arith.constant 0 : index
    %c0_64 = arith.constant 0 : index
    %77 = vector.load %arg4[%c0_61, %c0_62, %c2, %c0_63, %c0_64] : memref<1x1x4x8x32xf32, #tpu.memory_space<vmem>>, vector<1x1x1x8x32xf32>
    %78 = vector.shape_cast %77 : vector<1x1x1x8x32xf32> to vector<8x32xf32>
    %79 = arith.addf %76, %78 : vector<8x32xf32>
    %cst_65 = arith.constant dense<0xFF800000> : vector<8xf32>
    %80 = vector.multi_reduction <maximumf>, %79, %cst_65 [1] : vector<8x32xf32> to vector<8xf32>
    %81 = vector.shape_cast %80 : vector<8xf32> to vector<8x1xf32>
    %82 = vector.broadcast %81 : vector<8x1xf32> to vector<8x32xf32>
    %83 = arith.subf %79, %82 : vector<8x32xf32>
    %84 = math.exp %83 : vector<8x32xf32>
    %cst_66 = arith.constant dense<0.000000e+00> : vector<8xf32>
    %85 = vector.multi_reduction <add>, %84, %cst_66 [1] : vector<8x32xf32> to vector<8xf32>
    %86 = vector.shape_cast %85 : vector<8xf32> to vector<8x1xf32>
    %cst_67 = arith.constant dense<0.000000e+00> : vector<8x8xf32>
    %87 = tpu.matmul %84, %40, %cst_67 {dimension_numbers = #tpu.dot_dimension_numbers<[1], [0], [0], [1], [0, 0, 1, 1], [], []>} : vector<8x32xf32>, vector<32x8xf32>, vector<8x8xf32> -> vector<8x8xf32>
    %88 = tpu.reciprocal %86 {approx = true} : vector<8x1xf32> -> vector<8x1xf32>
    %89 = vector.broadcast %88 : vector<8x1xf32> to vector<8x8xf32>
    %90 = arith.mulf %87, %89 : vector<8x8xf32>
    %c0_68 = arith.constant 0 : index
    %c64 = arith.constant 64 : index
    %91 = vector.load %arg16[%c0_68, %c64] : memref<8x128xf32, #tpu.memory_space<vmem>>, vector<8x8xf32>
    tpu.vector_store %arg16[%c0_68, %c64], %90 {strides = array<i32>} : memref<8x128xf32, #tpu.memory_space<vmem>>, vector<8x8xf32>,
    %92 = vector.extract_strided_slice %8 {offsets = [0, 96], sizes = [8, 8], strides = [1, 1]} : vector<8x128xf32> to vector<8x8xf32>
    %cst_69 = arith.constant dense<0.000000e+00> : vector<8x32xf32>
    %93 = tpu.matmul %92, %39, %cst_69 {dimension_numbers = #tpu.dot_dimension_numbers<[1], [1], [0], [0], [0, 0, 1, 0], [], []>} : vector<8x8xf32>, vector<32x8xf32>, vector<8x32xf32> -> vector<8x32xf32>
    %c0_70 = arith.constant 0 : index
    %c0_71 = arith.constant 0 : index
    %c3 = arith.constant 3 : index
    %c0_72 = arith.constant 0 : index
    %c0_73 = arith.constant 0 : index
    %94 = vector.load %arg4[%c0_70, %c0_71, %c3, %c0_72, %c0_73] : memref<1x1x4x8x32xf32, #tpu.memory_space<vmem>>, vector<1x1x1x8x32xf32>
    %95 = vector.shape_cast %94 : vector<1x1x1x8x32xf32> to vector<8x32xf32>
    %96 = arith.addf %93, %95 : vector<8x32xf32>
    %cst_74 = arith.constant dense<0xFF800000> : vector<8xf32>
    %97 = vector.multi_reduction <maximumf>, %96, %cst_74 [1] : vector<8x32xf32> to vector<8xf32>
    %98 = vector.shape_cast %97 : vector<8xf32> to vector<8x1xf32>
    %99 = vector.broadcast %98 : vector<8x1xf32> to vector<8x32xf32>
    %100 = arith.subf %96, %99 : vector<8x32xf32>
    %101 = math.exp %100 : vector<8x32xf32>
    %cst_75 = arith.constant dense<0.000000e+00> : vector<8xf32>
    %102 = vector.multi_reduction <add>, %101, %cst_75 [1] : vector<8x32xf32> to vector<8xf32>
    %103 = vector.shape_cast %102 : vector<8xf32> to vector<8x1xf32>
    %cst_76 = arith.constant dense<0.000000e+00> : vector<8x8xf32>
    %104 = tpu.matmul %101, %40, %cst_76 {dimension_numbers = #tpu.dot_dimension_numbers<[1], [0], [0], [1], [0, 0, 1, 1], [], []>} : vector<8x32xf32>, vector<32x8xf32>, vector<8x8xf32> -> vector<8x8xf32>
    %105 = tpu.reciprocal %103 {approx = true} : vector<8x1xf32> -> vector<8x1xf32>
    %106 = vector.broadcast %105 : vector<8x1xf32> to vector<8x8xf32>
    %107 = arith.mulf %104, %106 : vector<8x8xf32>
    %c0_77 = arith.constant 0 : index
    %c96 = arith.constant 96 : index
    %108 = vector.load %arg16[%c0_77, %c96] : memref<8x128xf32, #tpu.memory_space<vmem>>, vector<8x8xf32>
    tpu.vector_store %arg16[%c0_77, %c96], %107 {strides = array<i32>} : memref<8x128xf32, #tpu.memory_space<vmem>>, vector<8x8xf32>,
    %c0_78 = arith.constant 0 : index
    %c8_79 = arith.constant 8 : index
    %109 = vector.load %arg14[%c0_78, %c8_79] : memref<32x32xf32, #tpu.memory_space<vmem>>, vector<32x8xf32>
    %c0_80 = arith.constant 0 : index
    %c8_81 = arith.constant 8 : index
    %110 = vector.load %arg15[%c0_80, %c8_81] : memref<32x32xf32, #tpu.memory_space<vmem>>, vector<32x8xf32>
    %111 = vector.extract_strided_slice %8 {offsets = [0, 8], sizes = [8, 8], strides = [1, 1]} : vector<8x128xf32> to vector<8x8xf32>
    %cst_82 = arith.constant dense<0.000000e+00> : vector<8x32xf32>
    %112 = tpu.matmul %111, %109, %cst_82 {dimension_numbers = #tpu.dot_dimension_numbers<[1], [1], [0], [0], [0, 0, 1, 0], [], []>} : vector<8x8xf32>, vector<32x8xf32>, vector<8x32xf32> -> vector<8x32xf32>
    %c0_83 = arith.constant 0 : index
    %c0_84 = arith.constant 0 : index
    %c0_85 = arith.constant 0 : index
    %c0_86 = arith.constant 0 : index
    %c0_87 = arith.constant 0 : index
    %113 = vector.load %arg4[%c0_83, %c0_84, %c0_85, %c0_86, %c0_87] : memref<1x1x4x8x32xf32, #tpu.memory_space<vmem>>, vector<1x1x1x8x32xf32>
    %114 = vector.shape_cast %113 : vector<1x1x1x8x32xf32> to vector<8x32xf32>
    %115 = arith.addf %112, %114 : vector<8x32xf32>
    %cst_88 = arith.constant dense<0xFF800000> : vector<8xf32>
    %116 = vector.multi_reduction <maximumf>, %115, %cst_88 [1] : vector<8x32xf32> to vector<8xf32>
    %117 = vector.shape_cast %116 : vector<8xf32> to vector<8x1xf32>
    %118 = vector.broadcast %117 : vector<8x1xf32> to vector<8x32xf32>
    %119 = arith.subf %115, %118 : vector<8x32xf32>
    %120 = math.exp %119 : vector<8x32xf32>
    %cst_89 = arith.constant dense<0.000000e+00> : vector<8xf32>
    %121 = vector.multi_reduction <add>, %120, %cst_89 [1] : vector<8x32xf32> to vector<8xf32>
    %122 = vector.shape_cast %121 : vector<8xf32> to vector<8x1xf32>
    %cst_90 = arith.constant dense<0.000000e+00> : vector<8x8xf32>
    %123 = tpu.matmul %120, %110, %cst_90 {dimension_numbers = #tpu.dot_dimension_numbers<[1], [0], [0], [1], [0, 0, 1, 1], [], []>} : vector<8x32xf32>, vector<32x8xf32>, vector<8x8xf32> -> vector<8x8xf32>
    %124 = tpu.reciprocal %122 {approx = true} : vector<8x1xf32> -> vector<8x1xf32>
    %125 = vector.broadcast %124 : vector<8x1xf32> to vector<8x8xf32>
    %126 = arith.mulf %123, %125 : vector<8x8xf32>
    %c0_91 = arith.constant 0 : index
    %c8_92 = arith.constant 8 : index
    %127 = vector.load %arg16[%c0_91, %c8_92] : memref<8x128xf32, #tpu.memory_space<vmem>>, vector<8x8xf32>
    tpu.vector_store %arg16[%c0_91, %c8_92], %126 {strides = array<i32>} : memref<8x128xf32, #tpu.memory_space<vmem>>, vector<8x8xf32>,
    %128 = vector.extract_strided_slice %8 {offsets = [0, 40], sizes = [8, 8], strides = [1, 1]} : vector<8x128xf32> to vector<8x8xf32>
    %cst_93 = arith.constant dense<0.000000e+00> : vector<8x32xf32>
    %129 = tpu.matmul %128, %109, %cst_93 {dimension_numbers = #tpu.dot_dimension_numbers<[1], [1], [0], [0], [0, 0, 1, 0], [], []>} : vector<8x8xf32>, vector<32x8xf32>, vector<8x32xf32> -> vector<8x32xf32>
    %c0_94 = arith.constant 0 : index
    %c0_95 = arith.constant 0 : index
    %c1_96 = arith.constant 1 : index
    %c0_97 = arith.constant 0 : index
    %c0_98 = arith.constant 0 : index
    %130 = vector.load %arg4[%c0_94, %c0_95, %c1_96, %c0_97, %c0_98] : memref<1x1x4x8x32xf32, #tpu.memory_space<vmem>>, vector<1x1x1x8x32xf32>
    %131 = vector.shape_cast %130 : vector<1x1x1x8x32xf32> to vector<8x32xf32>
    %132 = arith.addf %129, %131 : vector<8x32xf32>
    %cst_99 = arith.constant dense<0xFF800000> : vector<8xf32>
    %133 = vector.multi_reduction <maximumf>, %132, %cst_99 [1] : vector<8x32xf32> to vector<8xf32>
    %134 = vector.shape_cast %133 : vector<8xf32> to vector<8x1xf32>
    %135 = vector.broadcast %134 : vector<8x1xf32> to vector<8x32xf32>
    %136 = arith.subf %132, %135 : vector<8x32xf32>
    %137 = math.exp %136 : vector<8x32xf32>
    %cst_100 = arith.constant dense<0.000000e+00> : vector<8xf32>
    %138 = vector.multi_reduction <add>, %137, %cst_100 [1] : vector<8x32xf32> to vector<8xf32>
    %139 = vector.shape_cast %138 : vector<8xf32> to vector<8x1xf32>
    %cst_101 = arith.constant dense<0.000000e+00> : vector<8x8xf32>
    %140 = tpu.matmul %137, %110, %cst_101 {dimension_numbers = #tpu.dot_dimension_numbers<[1], [0], [0], [1], [0, 0, 1, 1], [], []>} : vector<8x32xf32>, vector<32x8xf32>, vector<8x8xf32> -> vector<8x8xf32>
    %141 = tpu.reciprocal %139 {approx = true} : vector<8x1xf32> -> vector<8x1xf32>
    %142 = vector.broadcast %141 : vector<8x1xf32> to vector<8x8xf32>
    %143 = arith.mulf %140, %142 : vector<8x8xf32>
    %c0_102 = arith.constant 0 : index
    %c40 = arith.constant 40 : index
    %144 = vector.load %arg16[%c0_102, %c40] : memref<8x128xf32, #tpu.memory_space<vmem>>, vector<8x8xf32>
    tpu.vector_store %arg16[%c0_102, %c40], %143 {strides = array<i32>} : memref<8x128xf32, #tpu.memory_space<vmem>>, vector<8x8xf32>,
    %145 = vector.extract_strided_slice %8 {offsets = [0, 72], sizes = [8, 8], strides = [1, 1]} : vector<8x128xf32> to vector<8x8xf32>
    %cst_103 = arith.constant dense<0.000000e+00> : vector<8x32xf32>
    %146 = tpu.matmul %145, %109, %cst_103 {dimension_numbers = #tpu.dot_dimension_numbers<[1], [1], [0], [0], [0, 0, 1, 0], [], []>} : vector<8x8xf32>, vector<32x8xf32>, vector<8x32xf32> -> vector<8x32xf32>
    %c0_104 = arith.constant 0 : index
    %c0_105 = arith.constant 0 : index
    %c2_106 = arith.constant 2 : index
    %c0_107 = arith.constant 0 : index
    %c0_108 = arith.constant 0 : index
    %147 = vector.load %arg4[%c0_104, %c0_105, %c2_106, %c0_107, %c0_108] : memref<1x1x4x8x32xf32, #tpu.memory_space<vmem>>, vector<1x1x1x8x32xf32>
    %148 = vector.shape_cast %147 : vector<1x1x1x8x32xf32> to vector<8x32xf32>
    %149 = arith.addf %146, %148 : vector<8x32xf32>
    %cst_109 = arith.constant dense<0xFF800000> : vector<8xf32>
    %150 = vector.multi_reduction <maximumf>, %149, %cst_109 [1] : vector<8x32xf32> to vector<8xf32>
    %151 = vector.shape_cast %150 : vector<8xf32> to vector<8x1xf32>
    %152 = vector.broadcast %151 : vector<8x1xf32> to vector<8x32xf32>
    %153 = arith.subf %149, %152 : vector<8x32xf32>
    %154 = math.exp %153 : vector<8x32xf32>
    %cst_110 = arith.constant dense<0.000000e+00> : vector<8xf32>
    %155 = vector.multi_reduction <add>, %154, %cst_110 [1] : vector<8x32xf32> to vector<8xf32>
    %156 = vector.shape_cast %155 : vector<8xf32> to vector<8x1xf32>
    %cst_111 = arith.constant dense<0.000000e+00> : vector<8x8xf32>
    %157 = tpu.matmul %154, %110, %cst_111 {dimension_numbers = #tpu.dot_dimension_numbers<[1], [0], [0], [1], [0, 0, 1, 1], [], []>} : vector<8x32xf32>, vector<32x8xf32>, vector<8x8xf32> -> vector<8x8xf32>
    %158 = tpu.reciprocal %156 {approx = true} : vector<8x1xf32> -> vector<8x1xf32>
    %159 = vector.broadcast %158 : vector<8x1xf32> to vector<8x8xf32>
    %160 = arith.mulf %157, %159 : vector<8x8xf32>
    %c0_112 = arith.constant 0 : index
    %c72 = arith.constant 72 : index
    %161 = vector.load %arg16[%c0_112, %c72] : memref<8x128xf32, #tpu.memory_space<vmem>>, vector<8x8xf32>
    tpu.vector_store %arg16[%c0_112, %c72], %160 {strides = array<i32>} : memref<8x128xf32, #tpu.memory_space<vmem>>, vector<8x8xf32>,
    %162 = vector.extract_strided_slice %8 {offsets = [0, 104], sizes = [8, 8], strides = [1, 1]} : vector<8x128xf32> to vector<8x8xf32>
    %cst_113 = arith.constant dense<0.000000e+00> : vector<8x32xf32>
    %163 = tpu.matmul %162, %109, %cst_113 {dimension_numbers = #tpu.dot_dimension_numbers<[1], [1], [0], [0], [0, 0, 1, 0], [], []>} : vector<8x8xf32>, vector<32x8xf32>, vector<8x32xf32> -> vector<8x32xf32>
    %c0_114 = arith.constant 0 : index
    %c0_115 = arith.constant 0 : index
    %c3_116 = arith.constant 3 : index
    %c0_117 = arith.constant 0 : index
    %c0_118 = arith.constant 0 : index
    %164 = vector.load %arg4[%c0_114, %c0_115, %c3_116, %c0_117, %c0_118] : memref<1x1x4x8x32xf32, #tpu.memory_space<vmem>>, vector<1x1x1x8x32xf32>
    %165 = vector.shape_cast %164 : vector<1x1x1x8x32xf32> to vector<8x32xf32>
    %166 = arith.addf %163, %165 : vector<8x32xf32>
    %cst_119 = arith.constant dense<0xFF800000> : vector<8xf32>
    %167 = vector.multi_reduction <maximumf>, %166, %cst_119 [1] : vector<8x32xf32> to vector<8xf32>
    %168 = vector.shape_cast %167 : vector<8xf32> to vector<8x1xf32>
    %169 = vector.broadcast %168 : vector<8x1xf32> to vector<8x32xf32>
    %170 = arith.subf %166, %169 : vector<8x32xf32>
    %171 = math.exp %170 : vector<8x32xf32>
    %cst_120 = arith.constant dense<0.000000e+00> : vector<8xf32>
    %172 = vector.multi_reduction <add>, %171, %cst_120 [1] : vector<8x32xf32> to vector<8xf32>
    %173 = vector.shape_cast %172 : vector<8xf32> to vector<8x1xf32>
    %cst_121 = arith.constant dense<0.000000e+00> : vector<8x8xf32>
    %174 = tpu.matmul %171, %110, %cst_121 {dimension_numbers = #tpu.dot_dimension_numbers<[1], [0], [0], [1], [0, 0, 1, 1], [], []>} : vector<8x32xf32>, vector<32x8xf32>, vector<8x8xf32> -> vector<8x8xf32>
    %175 = tpu.reciprocal %173 {approx = true} : vector<8x1xf32> -> vector<8x1xf32>
    %176 = vector.broadcast %175 : vector<8x1xf32> to vector<8x8xf32>
    %177 = arith.mulf %174, %176 : vector<8x8xf32>
    %c0_122 = arith.constant 0 : index
    %c104 = arith.constant 104 : index
    %178 = vector.load %arg16[%c0_122, %c104] : memref<8x128xf32, #tpu.memory_space<vmem>>, vector<8x8xf32>
    tpu.vector_store %arg16[%c0_122, %c104], %177 {strides = array<i32>} : memref<8x128xf32, #tpu.memory_space<vmem>>, vector<8x8xf32>,
    %c0_123 = arith.constant 0 : index
    %c16_124 = arith.constant 16 : index
    %179 = vector.load %arg14[%c0_123, %c16_124] : memref<32x32xf32, #tpu.memory_space<vmem>>, vector<32x8xf32>
    %c0_125 = arith.constant 0 : index
    %c16_126 = arith.constant 16 : index
    %180 = vector.load %arg15[%c0_125, %c16_126] : memref<32x32xf32, #tpu.memory_space<vmem>>, vector<32x8xf32>
    %181 = vector.extract_strided_slice %8 {offsets = [0, 16], sizes = [8, 8], strides = [1, 1]} : vector<8x128xf32> to vector<8x8xf32>
    %cst_127 = arith.constant dense<0.000000e+00> : vector<8x32xf32>
    %182 = tpu.matmul %181, %179, %cst_127 {dimension_numbers = #tpu.dot_dimension_numbers<[1], [1], [0], [0], [0, 0, 1, 0], [], []>} : vector<8x8xf32>, vector<32x8xf32>, vector<8x32xf32> -> vector<8x32xf32>
    %c0_128 = arith.constant 0 : index
    %c0_129 = arith.constant 0 : index
    %c0_130 = arith.constant 0 : index
    %c0_131 = arith.constant 0 : index
    %c0_132 = arith.constant 0 : index
    %183 = vector.load %arg4[%c0_128, %c0_129, %c0_130, %c0_131, %c0_132] : memref<1x1x4x8x32xf32, #tpu.memory_space<vmem>>, vector<1x1x1x8x32xf32>
    %184 = vector.shape_cast %183 : vector<1x1x1x8x32xf32> to vector<8x32xf32>
    %185 = arith.addf %182, %184 : vector<8x32xf32>
    %cst_133 = arith.constant dense<0xFF800000> : vector<8xf32>
    %186 = vector.multi_reduction <maximumf>, %185, %cst_133 [1] : vector<8x32xf32> to vector<8xf32>
    %187 = vector.shape_cast %186 : vector<8xf32> to vector<8x1xf32>
    %188 = vector.broadcast %187 : vector<8x1xf32> to vector<8x32xf32>
    %189 = arith.subf %185, %188 : vector<8x32xf32>
    %190 = math.exp %189 : vector<8x32xf32>
    %cst_134 = arith.constant dense<0.000000e+00> : vector<8xf32>
    %191 = vector.multi_reduction <add>, %190, %cst_134 [1] : vector<8x32xf32> to vector<8xf32>
    %192 = vector.shape_cast %191 : vector<8xf32> to vector<8x1xf32>
    %cst_135 = arith.constant dense<0.000000e+00> : vector<8x8xf32>
    %193 = tpu.matmul %190, %180, %cst_135 {dimension_numbers = #tpu.dot_dimension_numbers<[1], [0], [0], [1], [0, 0, 1, 1], [], []>} : vector<8x32xf32>, vector<32x8xf32>, vector<8x8xf32> -> vector<8x8xf32>
    %194 = tpu.reciprocal %192 {approx = true} : vector<8x1xf32> -> vector<8x1xf32>
    %195 = vector.broadcast %194 : vector<8x1xf32> to vector<8x8xf32>
    %196 = arith.mulf %193, %195 : vector<8x8xf32>
    %c0_136 = arith.constant 0 : index
    %c16_137 = arith.constant 16 : index
    %197 = vector.load %arg16[%c0_136, %c16_137] : memref<8x128xf32, #tpu.memory_space<vmem>>, vector<8x8xf32>
    tpu.vector_store %arg16[%c0_136, %c16_137], %196 {strides = array<i32>} : memref<8x128xf32, #tpu.memory_space<vmem>>, vector<8x8xf32>,
    %198 = vector.extract_strided_slice %8 {offsets = [0, 48], sizes = [8, 8], strides = [1, 1]} : vector<8x128xf32> to vector<8x8xf32>
    %cst_138 = arith.constant dense<0.000000e+00> : vector<8x32xf32>
    %199 = tpu.matmul %198, %179, %cst_138 {dimension_numbers = #tpu.dot_dimension_numbers<[1], [1], [0], [0], [0, 0, 1, 0], [], []>} : vector<8x8xf32>, vector<32x8xf32>, vector<8x32xf32> -> vector<8x32xf32>
    %c0_139 = arith.constant 0 : index
    %c0_140 = arith.constant 0 : index
    %c1_141 = arith.constant 1 : index
    %c0_142 = arith.constant 0 : index
    %c0_143 = arith.constant 0 : index
    %200 = vector.load %arg4[%c0_139, %c0_140, %c1_141, %c0_142, %c0_143] : memref<1x1x4x8x32xf32, #tpu.memory_space<vmem>>, vector<1x1x1x8x32xf32>
    %201 = vector.shape_cast %200 : vector<1x1x1x8x32xf32> to vector<8x32xf32>
    %202 = arith.addf %199, %201 : vector<8x32xf32>
    %cst_144 = arith.constant dense<0xFF800000> : vector<8xf32>
    %203 = vector.multi_reduction <maximumf>, %202, %cst_144 [1] : vector<8x32xf32> to vector<8xf32>
    %204 = vector.shape_cast %203 : vector<8xf32> to vector<8x1xf32>
    %205 = vector.broadcast %204 : vector<8x1xf32> to vector<8x32xf32>
    %206 = arith.subf %202, %205 : vector<8x32xf32>
    %207 = math.exp %206 : vector<8x32xf32>
    %cst_145 = arith.constant dense<0.000000e+00> : vector<8xf32>
    %208 = vector.multi_reduction <add>, %207, %cst_145 [1] : vector<8x32xf32> to vector<8xf32>
    %209 = vector.shape_cast %208 : vector<8xf32> to vector<8x1xf32>
    %cst_146 = arith.constant dense<0.000000e+00> : vector<8x8xf32>
    %210 = tpu.matmul %207, %180, %cst_146 {dimension_numbers = #tpu.dot_dimension_numbers<[1], [0], [0], [1], [0, 0, 1, 1], [], []>} : vector<8x32xf32>, vector<32x8xf32>, vector<8x8xf32> -> vector<8x8xf32>
    %211 = tpu.reciprocal %209 {approx = true} : vector<8x1xf32> -> vector<8x1xf32>
    %212 = vector.broadcast %211 : vector<8x1xf32> to vector<8x8xf32>
    %213 = arith.mulf %210, %212 : vector<8x8xf32>
    %c0_147 = arith.constant 0 : index
    %c48 = arith.constant 48 : index
    %214 = vector.load %arg16[%c0_147, %c48] : memref<8x128xf32, #tpu.memory_space<vmem>>, vector<8x8xf32>
    tpu.vector_store %arg16[%c0_147, %c48], %213 {strides = array<i32>} : memref<8x128xf32, #tpu.memory_space<vmem>>, vector<8x8xf32>,
    %215 = vector.extract_strided_slice %8 {offsets = [0, 80], sizes = [8, 8], strides = [1, 1]} : vector<8x128xf32> to vector<8x8xf32>
    %cst_148 = arith.constant dense<0.000000e+00> : vector<8x32xf32>
    %216 = tpu.matmul %215, %179, %cst_148 {dimension_numbers = #tpu.dot_dimension_numbers<[1], [1], [0], [0], [0, 0, 1, 0], [], []>} : vector<8x8xf32>, vector<32x8xf32>, vector<8x32xf32> -> vector<8x32xf32>
    %c0_149 = arith.constant 0 : index
    %c0_150 = arith.constant 0 : index
    %c2_151 = arith.constant 2 : index
    %c0_152 = arith.constant 0 : index
    %c0_153 = arith.constant 0 : index
    %217 = vector.load %arg4[%c0_149, %c0_150, %c2_151, %c0_152, %c0_153] : memref<1x1x4x8x32xf32, #tpu.memory_space<vmem>>, vector<1x1x1x8x32xf32>
    %218 = vector.shape_cast %217 : vector<1x1x1x8x32xf32> to vector<8x32xf32>
    %219 = arith.addf %216, %218 : vector<8x32xf32>
    %cst_154 = arith.constant dense<0xFF800000> : vector<8xf32>
    %220 = vector.multi_reduction <maximumf>, %219, %cst_154 [1] : vector<8x32xf32> to vector<8xf32>
    %221 = vector.shape_cast %220 : vector<8xf32> to vector<8x1xf32>
    %222 = vector.broadcast %221 : vector<8x1xf32> to vector<8x32xf32>
    %223 = arith.subf %219, %222 : vector<8x32xf32>
    %224 = math.exp %223 : vector<8x32xf32>
    %cst_155 = arith.constant dense<0.000000e+00> : vector<8xf32>
    %225 = vector.multi_reduction <add>, %224, %cst_155 [1] : vector<8x32xf32> to vector<8xf32>
    %226 = vector.shape_cast %225 : vector<8xf32> to vector<8x1xf32>
    %cst_156 = arith.constant dense<0.000000e+00> : vector<8x8xf32>
    %227 = tpu.matmul %224, %180, %cst_156 {dimension_numbers = #tpu.dot_dimension_numbers<[1], [0], [0], [1], [0, 0, 1, 1], [], []>} : vector<8x32xf32>, vector<32x8xf32>, vector<8x8xf32> -> vector<8x8xf32>
    %228 = tpu.reciprocal %226 {approx = true} : vector<8x1xf32> -> vector<8x1xf32>
    %229 = vector.broadcast %228 : vector<8x1xf32> to vector<8x8xf32>
    %230 = arith.mulf %227, %229 : vector<8x8xf32>
    %c0_157 = arith.constant 0 : index
    %c80 = arith.constant 80 : index
    %231 = vector.load %arg16[%c0_157, %c80] : memref<8x128xf32, #tpu.memory_space<vmem>>, vector<8x8xf32>
    tpu.vector_store %arg16[%c0_157, %c80], %230 {strides = array<i32>} : memref<8x128xf32, #tpu.memory_space<vmem>>, vector<8x8xf32>,
    %232 = vector.extract_strided_slice %8 {offsets = [0, 112], sizes = [8, 8], strides = [1, 1]} : vector<8x128xf32> to vector<8x8xf32>
    %cst_158 = arith.constant dense<0.000000e+00> : vector<8x32xf32>
    %233 = tpu.matmul %232, %179, %cst_158 {dimension_numbers = #tpu.dot_dimension_numbers<[1], [1], [0], [0], [0, 0, 1, 0], [], []>} : vector<8x8xf32>, vector<32x8xf32>, vector<8x32xf32> -> vector<8x32xf32>
    %c0_159 = arith.constant 0 : index
    %c0_160 = arith.constant 0 : index
    %c3_161 = arith.constant 3 : index
    %c0_162 = arith.constant 0 : index
    %c0_163 = arith.constant 0 : index
    %234 = vector.load %arg4[%c0_159, %c0_160, %c3_161, %c0_162, %c0_163] : memref<1x1x4x8x32xf32, #tpu.memory_space<vmem>>, vector<1x1x1x8x32xf32>
    %235 = vector.shape_cast %234 : vector<1x1x1x8x32xf32> to vector<8x32xf32>
    %236 = arith.addf %233, %235 : vector<8x32xf32>
    %cst_164 = arith.constant dense<0xFF800000> : vector<8xf32>
    %237 = vector.multi_reduction <maximumf>, %236, %cst_164 [1] : vector<8x32xf32> to vector<8xf32>
    %238 = vector.shape_cast %237 : vector<8xf32> to vector<8x1xf32>
    %239 = vector.broadcast %238 : vector<8x1xf32> to vector<8x32xf32>
    %240 = arith.subf %236, %239 : vector<8x32xf32>
    %241 = math.exp %240 : vector<8x32xf32>
    %cst_165 = arith.constant dense<0.000000e+00> : vector<8xf32>
    %242 = vector.multi_reduction <add>, %241, %cst_165 [1] : vector<8x32xf32> to vector<8xf32>
    %243 = vector.shape_cast %242 : vector<8xf32> to vector<8x1xf32>
    %cst_166 = arith.constant dense<0.000000e+00> : vector<8x8xf32>
    %244 = tpu.matmul %241, %180, %cst_166 {dimension_numbers = #tpu.dot_dimension_numbers<[1], [0], [0], [1], [0, 0, 1, 1], [], []>} : vector<8x32xf32>, vector<32x8xf32>, vector<8x8xf32> -> vector<8x8xf32>
    %245 = tpu.reciprocal %243 {approx = true} : vector<8x1xf32> -> vector<8x1xf32>
    %246 = vector.broadcast %245 : vector<8x1xf32> to vector<8x8xf32>
    %247 = arith.mulf %244, %246 : vector<8x8xf32>
    %c0_167 = arith.constant 0 : index
    %c112 = arith.constant 112 : index
    %248 = vector.load %arg16[%c0_167, %c112] : memref<8x128xf32, #tpu.memory_space<vmem>>, vector<8x8xf32>
    tpu.vector_store %arg16[%c0_167, %c112], %247 {strides = array<i32>} : memref<8x128xf32, #tpu.memory_space<vmem>>, vector<8x8xf32>,
    %c0_168 = arith.constant 0 : index
    %c24_169 = arith.constant 24 : index
    %249 = vector.load %arg14[%c0_168, %c24_169] : memref<32x32xf32, #tpu.memory_space<vmem>>, vector<32x8xf32>
    %c0_170 = arith.constant 0 : index
    %c24_171 = arith.constant 24 : index
    %250 = vector.load %arg15[%c0_170, %c24_171] : memref<32x32xf32, #tpu.memory_space<vmem>>, vector<32x8xf32>
    %251 = vector.extract_strided_slice %8 {offsets = [0, 24], sizes = [8, 8], strides = [1, 1]} : vector<8x128xf32> to vector<8x8xf32>
    %cst_172 = arith.constant dense<0.000000e+00> : vector<8x32xf32>
    %252 = tpu.matmul %251, %249, %cst_172 {dimension_numbers = #tpu.dot_dimension_numbers<[1], [1], [0], [0], [0, 0, 1, 0], [], []>} : vector<8x8xf32>, vector<32x8xf32>, vector<8x32xf32> -> vector<8x32xf32>
    %c0_173 = arith.constant 0 : index
    %c0_174 = arith.constant 0 : index
    %c0_175 = arith.constant 0 : index
    %c0_176 = arith.constant 0 : index
    %c0_177 = arith.constant 0 : index
    %253 = vector.load %arg4[%c0_173, %c0_174, %c0_175, %c0_176, %c0_177] : memref<1x1x4x8x32xf32, #tpu.memory_space<vmem>>, vector<1x1x1x8x32xf32>
    %254 = vector.shape_cast %253 : vector<1x1x1x8x32xf32> to vector<8x32xf32>
    %255 = arith.addf %252, %254 : vector<8x32xf32>
    %cst_178 = arith.constant dense<0xFF800000> : vector<8xf32>
    %256 = vector.multi_reduction <maximumf>, %255, %cst_178 [1] : vector<8x32xf32> to vector<8xf32>
    %257 = vector.shape_cast %256 : vector<8xf32> to vector<8x1xf32>
    %258 = vector.broadcast %257 : vector<8x1xf32> to vector<8x32xf32>
    %259 = arith.subf %255, %258 : vector<8x32xf32>
    %260 = math.exp %259 : vector<8x32xf32>
    %cst_179 = arith.constant dense<0.000000e+00> : vector<8xf32>
    %261 = vector.multi_reduction <add>, %260, %cst_179 [1] : vector<8x32xf32> to vector<8xf32>
    %262 = vector.shape_cast %261 : vector<8xf32> to vector<8x1xf32>
    %cst_180 = arith.constant dense<0.000000e+00> : vector<8x8xf32>
    %263 = tpu.matmul %260, %250, %cst_180 {dimension_numbers = #tpu.dot_dimension_numbers<[1], [0], [0], [1], [0, 0, 1, 1], [], []>} : vector<8x32xf32>, vector<32x8xf32>, vector<8x8xf32> -> vector<8x8xf32>
    %264 = tpu.reciprocal %262 {approx = true} : vector<8x1xf32> -> vector<8x1xf32>
    %265 = vector.broadcast %264 : vector<8x1xf32> to vector<8x8xf32>
    %266 = arith.mulf %263, %265 : vector<8x8xf32>
    %c0_181 = arith.constant 0 : index
    %c24_182 = arith.constant 24 : index
    %267 = vector.load %arg16[%c0_181, %c24_182] : memref<8x128xf32, #tpu.memory_space<vmem>>, vector<8x8xf32>
    tpu.vector_store %arg16[%c0_181, %c24_182], %266 {strides = array<i32>} : memref<8x128xf32, #tpu.memory_space<vmem>>, vector<8x8xf32>,
    %268 = vector.extract_strided_slice %8 {offsets = [0, 56], sizes = [8, 8], strides = [1, 1]} : vector<8x128xf32> to vector<8x8xf32>
    %cst_183 = arith.constant dense<0.000000e+00> : vector<8x32xf32>
    %269 = tpu.matmul %268, %249, %cst_183 {dimension_numbers = #tpu.dot_dimension_numbers<[1], [1], [0], [0], [0, 0, 1, 0], [], []>} : vector<8x8xf32>, vector<32x8xf32>, vector<8x32xf32> -> vector<8x32xf32>
    %c0_184 = arith.constant 0 : index
    %c0_185 = arith.constant 0 : index
    %c1_186 = arith.constant 1 : index
    %c0_187 = arith.constant 0 : index
    %c0_188 = arith.constant 0 : index
    %270 = vector.load %arg4[%c0_184, %c0_185, %c1_186, %c0_187, %c0_188] : memref<1x1x4x8x32xf32, #tpu.memory_space<vmem>>, vector<1x1x1x8x32xf32>
    %271 = vector.shape_cast %270 : vector<1x1x1x8x32xf32> to vector<8x32xf32>
    %272 = arith.addf %269, %271 : vector<8x32xf32>
    %cst_189 = arith.constant dense<0xFF800000> : vector<8xf32>
    %273 = vector.multi_reduction <maximumf>, %272, %cst_189 [1] : vector<8x32xf32> to vector<8xf32>
    %274 = vector.shape_cast %273 : vector<8xf32> to vector<8x1xf32>
    %275 = vector.broadcast %274 : vector<8x1xf32> to vector<8x32xf32>
    %276 = arith.subf %272, %275 : vector<8x32xf32>
    %277 = math.exp %276 : vector<8x32xf32>
    %cst_190 = arith.constant dense<0.000000e+00> : vector<8xf32>
    %278 = vector.multi_reduction <add>, %277, %cst_190 [1] : vector<8x32xf32> to vector<8xf32>
    %279 = vector.shape_cast %278 : vector<8xf32> to vector<8x1xf32>
    %cst_191 = arith.constant dense<0.000000e+00> : vector<8x8xf32>
    %280 = tpu.matmul %277, %250, %cst_191 {dimension_numbers = #tpu.dot_dimension_numbers<[1], [0], [0], [1], [0, 0, 1, 1], [], []>} : vector<8x32xf32>, vector<32x8xf32>, vector<8x8xf32> -> vector<8x8xf32>
    %281 = tpu.reciprocal %279 {approx = true} : vector<8x1xf32> -> vector<8x1xf32>
    %282 = vector.broadcast %281 : vector<8x1xf32> to vector<8x8xf32>
    %283 = arith.mulf %280, %282 : vector<8x8xf32>
    %c0_192 = arith.constant 0 : index
    %c56 = arith.constant 56 : index
    %284 = vector.load %arg16[%c0_192, %c56] : memref<8x128xf32, #tpu.memory_space<vmem>>, vector<8x8xf32>
    tpu.vector_store %arg16[%c0_192, %c56], %283 {strides = array<i32>} : memref<8x128xf32, #tpu.memory_space<vmem>>, vector<8x8xf32>,
    %285 = vector.extract_strided_slice %8 {offsets = [0, 88], sizes = [8, 8], strides = [1, 1]} : vector<8x128xf32> to vector<8x8xf32>
    %cst_193 = arith.constant dense<0.000000e+00> : vector<8x32xf32>
    %286 = tpu.matmul %285, %249, %cst_193 {dimension_numbers = #tpu.dot_dimension_numbers<[1], [1], [0], [0], [0, 0, 1, 0], [], []>} : vector<8x8xf32>, vector<32x8xf32>, vector<8x32xf32> -> vector<8x32xf32>
    %c0_194 = arith.constant 0 : index
    %c0_195 = arith.constant 0 : index
    %c2_196 = arith.constant 2 : index
    %c0_197 = arith.constant 0 : index
    %c0_198 = arith.constant 0 : index
    %287 = vector.load %arg4[%c0_194, %c0_195, %c2_196, %c0_197, %c0_198] : memref<1x1x4x8x32xf32, #tpu.memory_space<vmem>>, vector<1x1x1x8x32xf32>
    %288 = vector.shape_cast %287 : vector<1x1x1x8x32xf32> to vector<8x32xf32>
    %289 = arith.addf %286, %288 : vector<8x32xf32>
    %cst_199 = arith.constant dense<0xFF800000> : vector<8xf32>
    %290 = vector.multi_reduction <maximumf>, %289, %cst_199 [1] : vector<8x32xf32> to vector<8xf32>
    %291 = vector.shape_cast %290 : vector<8xf32> to vector<8x1xf32>
    %292 = vector.broadcast %291 : vector<8x1xf32> to vector<8x32xf32>
    %293 = arith.subf %289, %292 : vector<8x32xf32>
    %294 = math.exp %293 : vector<8x32xf32>
    %cst_200 = arith.constant dense<0.000000e+00> : vector<8xf32>
    %295 = vector.multi_reduction <add>, %294, %cst_200 [1] : vector<8x32xf32> to vector<8xf32>
    %296 = vector.shape_cast %295 : vector<8xf32> to vector<8x1xf32>
    %cst_201 = arith.constant dense<0.000000e+00> : vector<8x8xf32>
    %297 = tpu.matmul %294, %250, %cst_201 {dimension_numbers = #tpu.dot_dimension_numbers<[1], [0], [0], [1], [0, 0, 1, 1], [], []>} : vector<8x32xf32>, vector<32x8xf32>, vector<8x8xf32> -> vector<8x8xf32>
    %298 = tpu.reciprocal %296 {approx = true} : vector<8x1xf32> -> vector<8x1xf32>
    %299 = vector.broadcast %298 : vector<8x1xf32> to vector<8x8xf32>
    %300 = arith.mulf %297, %299 : vector<8x8xf32>
    %c0_202 = arith.constant 0 : index
    %c88 = arith.constant 88 : index
    %301 = vector.load %arg16[%c0_202, %c88] : memref<8x128xf32, #tpu.memory_space<vmem>>, vector<8x8xf32>
    tpu.vector_store %arg16[%c0_202, %c88], %300 {strides = array<i32>} : memref<8x128xf32, #tpu.memory_space<vmem>>, vector<8x8xf32>,
    %302 = vector.extract_strided_slice %8 {offsets = [0, 120], sizes = [8, 8], strides = [1, 1]} : vector<8x128xf32> to vector<8x8xf32>
    %cst_203 = arith.constant dense<0.000000e+00> : vector<8x32xf32>
    %303 = tpu.matmul %302, %249, %cst_203 {dimension_numbers = #tpu.dot_dimension_numbers<[1], [1], [0], [0], [0, 0, 1, 0], [], []>} : vector<8x8xf32>, vector<32x8xf32>, vector<8x32xf32> -> vector<8x32xf32>
    %c0_204 = arith.constant 0 : index
    %c0_205 = arith.constant 0 : index
    %c3_206 = arith.constant 3 : index
    %c0_207 = arith.constant 0 : index
    %c0_208 = arith.constant 0 : index
    %304 = vector.load %arg4[%c0_204, %c0_205, %c3_206, %c0_207, %c0_208] : memref<1x1x4x8x32xf32, #tpu.memory_space<vmem>>, vector<1x1x1x8x32xf32>
    %305 = vector.shape_cast %304 : vector<1x1x1x8x32xf32> to vector<8x32xf32>
    %306 = arith.addf %303, %305 : vector<8x32xf32>
    %cst_209 = arith.constant dense<0xFF800000> : vector<8xf32>
    %307 = vector.multi_reduction <maximumf>, %306, %cst_209 [1] : vector<8x32xf32> to vector<8xf32>
    %308 = vector.shape_cast %307 : vector<8xf32> to vector<8x1xf32>
    %309 = vector.broadcast %308 : vector<8x1xf32> to vector<8x32xf32>
    %310 = arith.subf %306, %309 : vector<8x32xf32>
    %311 = math.exp %310 : vector<8x32xf32>
    %cst_210 = arith.constant dense<0.000000e+00> : vector<8xf32>
    %312 = vector.multi_reduction <add>, %311, %cst_210 [1] : vector<8x32xf32> to vector<8xf32>
    %313 = vector.shape_cast %312 : vector<8xf32> to vector<8x1xf32>
    %cst_211 = arith.constant dense<0.000000e+00> : vector<8x8xf32>
    %314 = tpu.matmul %311, %250, %cst_211 {dimension_numbers = #tpu.dot_dimension_numbers<[1], [0], [0], [1], [0, 0, 1, 1], [], []>} : vector<8x32xf32>, vector<32x8xf32>, vector<8x8xf32> -> vector<8x8xf32>
    %315 = tpu.reciprocal %313 {approx = true} : vector<8x1xf32> -> vector<8x1xf32>
    %316 = vector.broadcast %315 : vector<8x1xf32> to vector<8x8xf32>
    %317 = arith.mulf %314, %316 : vector<8x8xf32>
    %c0_212 = arith.constant 0 : index
    %c120 = arith.constant 120 : index
    %318 = vector.load %arg16[%c0_212, %c120] : memref<8x128xf32, #tpu.memory_space<vmem>>, vector<8x8xf32>
    tpu.vector_store %arg16[%c0_212, %c120], %317 {strides = array<i32>} : memref<8x128xf32, #tpu.memory_space<vmem>>, vector<8x8xf32>,
    %c0_213 = arith.constant 0 : index
    %c0_214 = arith.constant 0 : index
    %319 = vector.load %arg16[%c0_213, %c0_214] : memref<8x128xf32, #tpu.memory_space<vmem>>, vector<8x128xf32>
    %c0_215 = arith.constant 0 : index
    %c0_216 = arith.constant 0 : index
    %320 = vector.load %arg11[%c0_215, %c0_216] : memref<128x128xf32, #tpu.memory_space<vmem>>, vector<128x128xf32>
    %cst_217 = arith.constant dense<0.000000e+00> : vector<8x128xf32>
    %321 = tpu.matmul %319, %320, %cst_217 {dimension_numbers = #tpu.dot_dimension_numbers<[1], [0], [0], [1], [0, 0, 1, 1], [], []>} : vector<8x128xf32>, vector<128x128xf32>, vector<8x128xf32> -> vector<8x128xf32>
    %c0_218 = arith.constant 0 : index
    %c0_219 = arith.constant 0 : index
    %322 = vector.load %arg12[%c0_218, %c0_219] : memref<1x128xf32, #tpu.memory_space<vmem>>, vector<1x128xf32>
    %323 = vector.broadcast %322 : vector<1x128xf32> to vector<8x128xf32>
    %324 = arith.addf %321, %323 : vector<8x128xf32>
    %c0_220 = arith.constant 0 : index
    %c0_221 = arith.constant 0 : index
    %c0_222 = arith.constant 0 : index
    %325 = vector.load %arg13[%c0_220, %c0_221, %c0_222] : memref<1x8x128xf32, #tpu.memory_space<vmem>>, vector<1x8x128xf32>
    %326 = vector.shape_cast %325 : vector<1x8x128xf32> to vector<8x128xf32>
    %327 = vector.shape_cast %324 : vector<8x128xf32> to vector<1x8x128xf32>
    tpu.vector_store %arg13[%c0_220, %c0_221, %c0_222], %327 {strides = array<i32>} : memref<1x8x128xf32, #tpu.memory_space<vmem>>, vector<1x8x128xf32>,
    return
  }
  func.func @transform_0(%arg0: i32) -> (i32, i32, i32) {
    %c0_i32 = arith.constant 0 : i32
    %c0_i32_0 = arith.constant 0 : i32
    %c0_i32_1 = arith.constant 0 : i32
    return %arg0, %c0_i32, %c0_i32_0 : i32, i32, i32
  }
  func.func @transform_1(%arg0: i32) -> (i32, i32, i32) {
    %c0_i32 = arith.constant 0 : i32
    %c0_i32_0 = arith.constant 0 : i32
    %c0_i32_1 = arith.constant 0 : i32
    return %arg0, %c0_i32, %c0_i32_0 : i32, i32, i32
  }
  func.func @transform_2(%arg0: i32) -> (i32, i32, i32) {
    %c0_i32 = arith.constant 0 : i32
    %c0_i32_0 = arith.constant 0 : i32
    %c0_i32_1 = arith.constant 0 : i32
    return %arg0, %c0_i32, %c0_i32_0 : i32, i32, i32
  }
  func.func @transform_3(%arg0: i32) -> (i32, i32, i32, i32, i32) {
    %c0_i32 = arith.constant 0 : i32
    %c0_i32_0 = arith.constant 0 : i32
    %c0_i32_1 = arith.constant 0 : i32
    %c0_i32_2 = arith.constant 0 : i32
    %c0_i32_3 = arith.constant 0 : i32
    return %arg0, %c0_i32, %c0_i32_0, %c0_i32_1, %c0_i32_2 : i32, i32, i32, i32, i32
  }
  func.func @transform_4(%arg0: i32) -> (i32, i32) {
    %c0_i32 = arith.constant 0 : i32
    %c0_i32_0 = arith.constant 0 : i32
    %c0_i32_1 = arith.constant 0 : i32
    return %c0_i32, %c0_i32_0 : i32, i32
  }
  func.func @transform_5(%arg0: i32) -> (i32, i32) {
    %c0_i32 = arith.constant 0 : i32
    %c0_i32_0 = arith.constant 0 : i32
    %c0_i32_1 = arith.constant 0 : i32
    return %c0_i32, %c0_i32_0 : i32, i32
  }
  func.func @transform_6(%arg0: i32) -> (i32, i32) {
    %c0_i32 = arith.constant 0 : i32
    %c0_i32_0 = arith.constant 0 : i32
    %c0_i32_1 = arith.constant 0 : i32
    return %c0_i32, %c0_i32_0 : i32, i32
  }
  func.func @transform_7(%arg0: i32) -> (i32, i32) {
    %c0_i32 = arith.constant 0 : i32
    %c0_i32_0 = arith.constant 0 : i32
    %c0_i32_1 = arith.constant 0 : i32
    return %c0_i32, %c0_i32_0 : i32, i32
  }
  func.func @transform_8(%arg0: i32) -> (i32, i32) {
    %c0_i32 = arith.constant 0 : i32
    %c0_i32_0 = arith.constant 0 : i32
    %c0_i32_1 = arith.constant 0 : i32
    return %c0_i32, %c0_i32_0 : i32, i32
  }
  func.func @transform_9(%arg0: i32) -> (i32, i32) {
    %c0_i32 = arith.constant 0 : i32
    %c0_i32_0 = arith.constant 0 : i32
    %c0_i32_1 = arith.constant 0 : i32
    return %c0_i32, %c0_i32_0 : i32, i32
  }
  func.func @transform_10(%arg0: i32) -> (i32, i32) {
    %c0_i32 = arith.constant 0 : i32
    %c0_i32_0 = arith.constant 0 : i32
    %c0_i32_1 = arith.constant 0 : i32
    return %c0_i32, %c0_i32_0 : i32, i32
  }
  func.func @transform_11(%arg0: i32) -> (i32, i32) {
    %c0_i32 = arith.constant 0 : i32
    %c0_i32_0 = arith.constant 0 : i32
    %c0_i32_1 = arith.constant 0 : i32
    return %c0_i32, %c0_i32_0 : i32, i32
  }
  func.func @transform_12(%arg0: i32) -> (i32, i32, i32) {
    %c0_i32 = arith.constant 0 : i32
    %c0_i32_0 = arith.constant 0 : i32
    %c0_i32_1 = arith.constant 0 : i32
    return %arg0, %c0_i32, %c0_i32_0 : i32, i32, i32
  }
}

</mosaic_0001>

<bundles_post_ra>
// kernel: multi_head_attention_pallas.1
= control target key start
LH: loop header
LB: loop body
LE: loop exit
PB: predicated region body
PF: predicated region fallthrough
CT: control target
= control target key end

     0   :  { %s2268_s21 = smov 0   ;;  %s2974_s0 = inlined_call_operand.vmem [shape: f32[2,8,128], index: 0, kind: input, shape index: {}]   ;;  %s2975_s1 = inlined_call_operand.vmem [shape: f32[2,8,128], index: 1, kind: input, shape index: {}]   ;;  %s2976_s2 = inlined_call_operand.vmem [shape: f32[2,8,128], index: 2, kind: input, shape index: {}]   ;;  %s2977_s3 = inlined_call_operand.vmem [shape: f32[2,1,4,8,32], index: 3, kind: input, shape index: {}]   ;;  %s2978_s4 = inlined_call_operand.vmem [shape: f32[128,128], index: 4, kind: input, shape index: {}]   ;;  %s2979_s5 = inlined_call_operand.vmem [shape: f32[1,128], index: 5, kind: input, shape index: {}]   ;;  %s2980_s6 = inlined_call_operand.vmem [shape: f32[128,128], index: 6, kind: input, shape index: {}]   ;;  %s2981_s7 = inlined_call_operand.vmem [shape: f32[1,128], index: 7, kind: input, shape index: {}]   ;;  %s2982_s8 = inlined_call_operand.vmem [shape: f32[128,128], index: 8, kind: input, shape index: {}]   ;;  %s2983_s9 = inlined_call_operand.vmem [shape: f32[1,128], index: 9, kind: input, shape index: {}]   ;;  %s2984_s10 = inlined_call_operand.vmem [shape: f32[128,128], index: 10, kind: input, shape index: {}]   ;;  %s2985_s11 = inlined_call_operand.vmem [shape: f32[1,128], index: 11, kind: input, shape index: {}]   ;;  %s2986_s12 = inlined_call_operand.vmem [shape: f32[2,8,128], index: 12, kind: output, shape index: {}]  }
   0x1 LB: > { %s1937_s22 = sadd.s32 4294967295, %s2186_s21   ;;  %p1941_p0 = scmp.ge.s32.totalorder %s2186_s21, 1  ;;  %s2186_s21 = sphi %s2268_s21, %s22_s21  }
   0x2   : > { %p389_p1 = scmp.lt.s32.totalorder %s2186_s21, 3 }
   0x4   : > { %p390_p2 = pnand %p1941_p0, %p389_p1 }
   0x5   : > { %p442_p3 = scmp.lt.s32.totalorder (!%p390_p2), %s1937_s22, 1  ;;  %s2188_s19 = smov (!%p390_p2), 96  }
   0x6   : > { %393 = sbr.rel (%p390_p2) target bundleno = 3202 (0xc82), region = 68  ;;  %s2189_s23 = smov (!%p390_p2), 32  }
   0x7   : > { %s2191_s29 = smov (!%p390_p2), 120   ;;  %s2193_s16 = smov (!%p390_p2), 88  }
   0x8   : > { %s2194_s17 = smov (!%p390_p2), 56   ;;  %s2195_s18 = smov (!%p390_p2), 112  }
   0x9   : > { %s2197_s24 = smov (!%p390_p2), 48   ;;  %s2198_s26 = smov (!%p390_p2), 16  }
   0xa   : > { %s2199_s27 = smov (!%p390_p2), 104   ;;  %s2201_s13 = smov (!%p390_p2), 40  }
   0xb   : > { %v521_v0 = vld [vmem:[%s2980_s6 + $0x78] sm:$0xff]  ;;  %v520_v1 = vld [vmem:[%s2980_s6 + $0x70] sm:$0xff]  ;;  %v519_v3 = vld [vmem:[%s2980_s6 + $0x68] sm:$0xff]  ;;  %s2988_s22 = smov (!%p442_p3, %s1937_s22), 1  ;;  %vm587_vm0 = vcmask 261120   ;;  %vm625_vm1 = vcmask 64512  }
   0xc   : > { %526 = vmatpush.msra.mxu1 %v521_v0  ;;  %v562_v2 = vld [vmem:[%s2982_s8 + $0x78] sm:$0xff]  ;;  %v561_v4 = vld [vmem:[%s2982_s8 + $0x70] sm:$0xff]  ;;  %v560_v5 = vld [vmem:[%s2982_s8 + $0x68] sm:$0xff]  ;;  %s2382_s25 = sshll.u32 %s2988_s22, 3  ;;  %s2058_s30 = sshll.u32 %s2988_s22, 5  ;;  %vm760_vm2 = vcmask 326912  }
   0xd   : > { %567 = vmatpush.msra.mxu2 %v562_v2  ;;  %v518_v6 = vld [vmem:[%s2980_s6 + $0x60] sm:$0xff]  ;;  %v517_v8 = vld [vmem:[%s2980_s6 + $0x58] sm:$0xff]  ;;  %v516_v10 = vld [vmem:[%s2980_s6 + $0x50] sm:$0xff]  ;;  %s449_s20 = scalar_lea.vmem %s2975_s1, %s2382_s25  ;;  %s453_s28 = scalar_lea.vmem %s2976_s2, %s2382_s25  ;;  %vm826_vm3 = vcmask 589312   ;;  %vm892_vm4 = vcmask 851712   ;;  %vm1001_vm5 = vcmask 130112  }
   0xe   : > { %527 = vmatpush.msra.mxu1 %v520_v1  ;;  %v559_v7 = vld [vmem:[%s2982_s8 + $0x60] sm:$0xff]  ;;  %v558_v9 = vld [vmem:[%s2982_s8 + $0x58] sm:$0xff]  ;;  %v557_v11 = vld [vmem:[%s2982_s8 + $0x50] sm:$0xff]  ;;  %s445_s14 = scalar_lea.vmem %s2974_s0, %s2382_s25  ;;  %s2559_s15 = scalar_lea.vmem %s2977_s3, %s2058_s30  ;;  %vm1066_vm6 = vcmask 392512   ;;  %vm1131_vm7 = vcmask 654912   ;;  %vm1196_vm8 = vcmask 917312  }
   0xf   : > { %568 = vmatpush.msra.mxu2 %v561_v4  ;;  %v515_v12 = vld [vmem:[%s2980_s6 + $0x48] sm:$0xff]  ;;  %v479_v14 = vld [vmem:[%s2978_s4 + $0x78] sm:$0xff]  ;;  %v478_v15 = vld [vmem:[%s2978_s4 + $0x70] sm:$0xff]  ;;  %s2192_s22 = smov 24   ;;  %s2200_s30 = smov 72   ;;  %vm1305_vm9 = vcmask 195712  }
  0x10   : > { %528 = vmatpush.msra.mxu1 %v519_v3  ;;  %v556_v13 = vld [vmem:[%s2982_s8 + $0x48] sm:$0xff]  ;;  %v514_v16 = vld [vmem:[%s2980_s6 + $0x40] sm:$0xff]  ;;  %484 = vmatpush.msra.mxu0 %v479_v14  ;;  %v513_v19 = vld [vmem:[%s2980_s6 + $0x38] sm:$0xff]  ;;  %vm1370_vm10 = vcmask 458112   ;;  %vm1435_vm11 = vcmask 720512   ;;  %vm1500_vm12 = vcmask 982912  }
  0x11   : > { %569 = vmatpush.msra.mxu2 %v560_v5  ;;  %v555_v17 = vld [vmem:[%s2982_s8 + $0x40] sm:$0xff]  ;;  %v477_v18 = vld [vmem:[%s2978_s4 + $0x68] sm:$0xff]  ;;  %v554_v20 = vld [vmem:[%s2982_s8 + $0x38] sm:$0xff]  ;;  %vm1609_vm13 = vcmask 261312   ;;  %vm1674_vm14 = vcmask 523712   ;;  %vm1739_vm15 = vcmask 786112  }
  0x12   : > { %529 = vmatpush.msra.mxu1 %v518_v6  ;;  %485 = vmatpush.msra.mxu0 %v478_v15  ;;  %v476_v21 = vld [vmem:[%s2978_s4 + $0x60] sm:$0xff]  ;;  %v512_v22 = vld [vmem:[%s2980_s6 + $0x30] sm:$0xff]  ;;  %v475_v24 = vld [vmem:[%s2978_s4 + $0x58] sm:$0xff] }
  0x13   : > { %570 = vmatpush.msra.mxu2 %v559_v7  ;;  %v553_v23 = vld [vmem:[%s2982_s8 + $0x30] sm:$0xff]  ;;  %v511_v25 = vld [vmem:[%s2980_s6 + $0x28] sm:$0xff]  ;;  %v510_v28 = vld [vmem:[%s2980_s6 + $0x20] sm:$0xff] }
  0x14   : > { %530 = vmatpush.msra.mxu1 %v517_v8  ;;  %486 = vmatpush.msra.mxu0 %v477_v18  ;;  %v552_v26 = vld [vmem:[%s2982_s8 + $0x28] sm:$0xff]  ;;  %v474_v27 = vld [vmem:[%s2978_s4 + $0x50] sm:$0xff]  ;;  %v551_v29 = vld [vmem:[%s2982_s8 + $0x20] sm:$0xff] }
  0x15   : > { %571 = vmatpush.msra.mxu2 %v558_v9  ;;  %v473_v30 = vld [vmem:[%s2978_s4 + $0x48] sm:$0xff]  ;;  %v509_v31 = vld [vmem:[%s2980_s6 + $0x18] sm:$0xff]  ;;  %v472_v33 = vld [vmem:[%s2978_s4 + $0x40] sm:$0xff] }
  0x16   : > { %531 = vmatpush.msra.mxu1 %v516_v10  ;;  %487 = vmatpush.msra.mxu0 %v476_v21  ;;  %v550_v32 = vld [vmem:[%s2982_s8 + $0x18] sm:$0xff]  ;;  %v508_v34 = vld [vmem:[%s2980_s6 + $0x10] sm:$0xff]  ;;  %v507_v37 = vld [vmem:[%s2980_s6 + $0x8] sm:$0xff] }
  0x17   : > { %572 = vmatpush.msra.mxu2 %v557_v11  ;;  %v549_v35 = vld [vmem:[%s2982_s8 + $0x10] sm:$0xff]  ;;  %v471_v36 = vld [vmem:[%s2978_s4 + $0x38] sm:$0xff]  ;;  %v548_v38 = vld [vmem:[%s2982_s8 + $0x8] sm:$0xff] }
  0x18   : > { %532 = vmatpush.msra.mxu1 %v515_v12  ;;  %488 = vmatpush.msra.mxu0 %v475_v24  ;;  %v470_v39 = vld [vmem:[%s2978_s4 + $0x30] sm:$0xff]  ;;  %v506_v40 = vld [vmem:[%s2980_s6] sm:$0xff]  ;;  %v469_v44 = vld [vmem:[%s2978_s4 + $0x28] sm:$0xff] }
  0x19   : > { %573 = vmatpush.msra.mxu2 %v556_v13  ;;  %v505_v41 = vld [vmem:[%s449_s20] sm:$0xff]  ;;  %v467_v46 = vld [vmem:[%s2978_s4 + $0x18] sm:$0xff]  ;;  %v466_v47 = vld [vmem:[%s2978_s4 + $0x10] sm:$0xff]  ;;  %s2196_s20 = smov 80  }
  0x1a   : > { %533 = vmatpush.msra.mxu1 %v514_v16  ;;  %489 = vmatpush.msra.mxu0 %v474_v27  ;;  %v547_v42 = vld [vmem:[%s2982_s8] sm:$0xff]  ;;  %v465_v48 = vld [vmem:[%s2978_s4 + $0x8] sm:$0xff] }
  0x1b   : > { %574 = vmatpush.msra.mxu2 %v555_v17  ;;  %v546_v43 = vld [vmem:[%s453_s28] sm:$0xff]  ;;  %s2190_s28 = smov 64  }
  0x1c   : > { %534 = vmatpush.msra.mxu1 %v513_v19  ;;  %490 = vmatpush.msra.mxu0 %v473_v30  ;;  %v468_v45 = vld [vmem:[%s2978_s4 + $0x20] sm:$0xff] }
  0x1d   : > { %575 = vmatpush.msra.mxu2 %v554_v20  ;;  %v464_v49 = vld [vmem:[%s2978_s4] sm:$0xff] }
  0x1e   : > { %535 = vmatpush.msra.mxu1 %v512_v22  ;;  %491 = vmatpush.msra.mxu0 %v472_v33  ;;  %v463_v50 = vld [vmem:[%s445_s14] sm:$0xff]  ;;  %s2202_s14 = smov 8  }
  0x1f   : > { %576 = vmatpush.msra.mxu2 %v553_v23  ;;  %v2112_v51 = vld [vmem:[%s2981_s7] ss:$0 sm:$0xff] }
  0x20   : > { %536 = vmatpush.msra.mxu1 %v511_v25  ;;  %492 = vmatpush.msra.mxu0 %v471_v36  ;;  %v2113_v54 = vld [vmem:[%s2983_s9] ss:$0 sm:$0xff] }
  0x21   : > { %577 = vmatpush.msra.mxu2 %v552_v26  ;;  %v2114_v57 = vld [vmem:[%s2979_s5] ss:$0 sm:$0xff] }
  0x22   : > { %537 = vmatpush.msra.mxu1 %v510_v28  ;;  %493 = vmatpush.msra.mxu0 %v470_v39  ;;  %v2566_v16 = vld [vmem:[%s2559_s15] sm:$0xff]  ;;  %v2593_v28 = vld [vmem:[%s2559_s15 + $0x8] sm:$0xff] }
  0x23   : > { %578 = vmatpush.msra.mxu2 %v551_v29 }
  0x24   : > { %538 = vmatpush.msra.mxu1 %v509_v31  ;;  %494 = vmatpush.msra.mxu0 %v469_v44 }
  0x25   : > { %579 = vmatpush.msra.mxu2 %v550_v32  ;;  %v2598_v32 = vld [vmem:[%s2559_s15 + $0x10] sm:$0xff] }
  0x26   : > { %539 = vmatpush.msra.mxu1 %v508_v34  ;;  %495 = vmatpush.msra.mxu0 %v468_v45 }
  0x27   : > { %580 = vmatpush.msra.mxu2 %v549_v35 }
  0x28   : > { %540 = vmatpush.msra.mxu1 %v507_v37  ;;  %496 = vmatpush.msra.mxu0 %v467_v46 }
  0x29   : > { %581 = vmatpush.msra.mxu2 %v548_v38 }
  0x2a   : > { %541 = vmatpush.msra.mxu1 %v506_v40  ;;  %497 = vmatpush.msra.mxu0 %v466_v47 }
  0x2b   : > { %542 = vmatmul.f32.vlgmr.msra.gmra.mxu1 %v505_v41  ;;  %582 = vmatpush.msra.mxu2 %v547_v42 }
  0x2c   : > { %583 = vmatmul.f32.vlgmr.msra.gmra.mxu2 %v546_v43  ;;  %498 = vmatpush.msra.mxu0 %v465_v48 }
  0x2e   : > { %499 = vmatpush.msra.mxu0 %v464_v49 }
  0x2f   : > { %500 = vmatmul.f32.vlgmr.msra.gmra.mxu0 %v463_v50 }
  0xa8   : > { %v543_v52 = vpop.f32.mrf.mxu1 }
  0xa9   : > { %v544_v53 = vadd.f32 %v2112_v51, %v543_v52 }
  0xab   : > { %588 = vst.msk [vmem:[#allocation2] sm:$0xff] %vm587_vm0, %v544_v53  ;;  %591 = vrot.lane.b32.xlu1 %v544_v53, %s2188_s19  ;;  %608 = vrot.lane.b32.xlu0 %v544_v53, %s2189_s23 }
  0xac   : > { %v501_v58 = vpop.f32.mrf.mxu0 }
  0xad   : > { %v502_v59 = vadd.f32 %v2114_v57, %v501_v58 }
  0xaf   : > { %v584_v55 = vpop.f32.mrf.mxu2  ;;  %v2457_v60 = vmul.f32 0.17677669, %v502_v59 }
  0xb0   : > { %v585_v56 = vadd.f32 %v2113_v54, %v584_v55 }
  0xb2   : > { %589 = vst.msk [vmem:[#allocation3] sm:$0xff] %vm587_vm0, %v585_v56  ;;  %604 = vrot.lane.b32.xlu2 %v585_v56, %s2190_s28  ;;  %v2494_v8 = vld [vmem:[#allocation2] sm:$0xff] }
  0xb3   : > { %600 = vrot.lane.b32.xlu0 %v544_v53, %s2190_s28  ;;  %612 = vrot.lane.b32.xlu1 %v585_v56, %s2189_s23 }
  0xb9   : > { %v2498_v10 = vld [vmem:[#allocation3] sm:$0xff] }
  0xbb   : > { %596 = vrot.lane.b32.xlu0 %v585_v56, %s2188_s19  ;;  %698 = vrot.lane.b32.xlu1 %v2457_v60, %s2188_s19  ;;  %v2640_v56 = vld [vmem:[%s2559_s15 + $0x18] sm:$0xff] }
 0x10c   : > { %v605_v61 = vpop.permute.xlu2 %604 }
 0x10d   : > { %607 = vst.msk [vmem:[#allocation3 + $0x10] sm:$0xff] %vm587_vm0, %v605_v61 }
 0x114   : > { %v2480_v6 = vld [vmem:[#allocation3 + $0x10] sm:$0xff] }
 0x11d   : > { %v592_v62 = vpop.permute.xlu1 %591  ;;  %v609_v63 = vpop.permute.xlu0 %608 }
 0x11e   : > { %594 = vst.msk [vmem:[#allocation2 + $0x8] sm:$0xff] %vm587_vm0, %v592_v62 }
 0x11f   : > { %611 = vst.msk [vmem:[#allocation2 + $0x18] sm:$0xff] %vm587_vm0, %v609_v63 }
 0x125   : > { %v601_v0 = vpop.permute.xlu0 %600  ;;  %v613_v1 = vpop.permute.xlu1 %612  ;;  %v2487_v7 = vld [vmem:[#allocation2 + $0x8] sm:$0xff] }
 0x126   : > { %603 = vst.msk [vmem:[#allocation2 + $0x10] sm:$0xff] %vm587_vm0, %v601_v0  ;;  %v2466_v2 = vld [vmem:[#allocation2 + $0x18] sm:$0xff] }
 0x127   : > { %1948 = vmatpush.xpose.msk.msrb.mxu1 %vm625_vm1, %v2466_v2  ;;  %915 = vrot.lane.b32.xlu1 %v2466_v2, %s2191_s29  ;;  %615 = vst.msk [vmem:[#allocation3 + $0x18] sm:$0xff] %vm587_vm0, %v613_v1 }
 0x12d   : > { %v597_v3 = vpop.permute.xlu0 %596  ;;  %v2473_v4 = vld [vmem:[#allocation2 + $0x10] sm:$0xff]  ;;  %v699_v11 = vpop.permute.xlu1 %698 }
 0x12e   : > { %599 = vst.msk [vmem:[#allocation3 + $0x8] sm:$0xff] %vm587_vm0, %v597_v3  ;;  %1949 = vmatpush.xpose.msk.msrb.mxu1 %vm625_vm1, %v2473_v4  ;;  %v2478_v5 = vld [vmem:[#allocation3 + $0x18] sm:$0xff] }
 0x12f   : > { %913 = vrot.lane.b32.xlu1 %v2473_v4, %s2191_s29  ;;  %685 = vmatpush.msra.mxu3 %v2478_v5  ;;  %v2606_v39 = vpack.i.bf16 %v2480_v6, %v2478_v5 }
 0x130   : > { %746 = vmatpush.msrb.mxu0 %v2478_v5  ;;  %812 = vmatpush.msrb.mxu2 %v2478_v5 }
 0x131   : > { %686 = vmatpush.msra.mxu3 %v2480_v6 }
 0x132   : > { %1950 = vmatpush.xpose.msk.msrb.mxu1 %vm625_vm1, %v2487_v7  ;;  %747 = vmatpush.msrb.mxu0 %v2480_v6 }
 0x133   : > { %813 = vmatpush.msrb.mxu2 %v2480_v6 }
 0x135   : > { %v2496_v9 = vld [vmem:[#allocation3 + $0x8] sm:$0xff] }
 0x136   : > { %1951 = vmatpush.xpose.msk.msrb.mxu1 %vm625_vm1, %v2494_v8  ;;  %687 = vmatpush.msra.mxu3 %v2496_v9  ;;  %v2614_v40 = vpack.i.bf16 %v2498_v10, %v2496_v9 }
 0x137   : > { %748 = vmatpush.msrb.mxu0 %v2496_v9  ;;  %764 = vrot.lane.b32.xlu1 %v2457_v60, %s2190_s28 }
 0x138   : > { %688 = vmatpush.msra.mxu3 %v2498_v10  ;;  %814 = vmatpush.msrb.mxu2 %v2496_v9 }
 0x139   : > { %749 = vmatpush.msrb.mxu0 %v2498_v10  ;;  %1952 = vmatmul.msk.f32.vlgmr.msrb.gmra.mxu1 %vm625_vm1, %v2457_v60 }
 0x13a   : > { %1962 = vmatpush.xpose.msk.msra.mxu1 %vm625_vm1, %v2466_v2  ;;  %1955 = vmatpush.xpose.msk.msrb.mxu3 %vm625_vm1, %v2466_v2 }
 0x13b   : > { %1969 = vmatpush.xpose.msk.msra.mxu0 %vm625_vm1, %v2466_v2  ;;  %815 = vmatpush.msrb.mxu2 %v2498_v10 }
 0x13d   : > { %878 = vmatpush.msra.mxu2 %v2478_v5 }
 0x13e   : > { %1963 = vmatpush.xpose.msk.msra.mxu1 %vm625_vm1, %v2473_v4  ;;  %1956 = vmatpush.xpose.msk.msrb.mxu3 %vm625_vm1, %v2473_v4 }
 0x13f   : > { %1970 = vmatpush.xpose.msk.msra.mxu0 %vm625_vm1, %v2473_v4  ;;  %911 = vrot.lane.b32.xlu1 %v2487_v7, %s2191_s29 }
 0x140   : > { %879 = vmatpush.msra.mxu2 %v2480_v6 }
 0x142   : > { %1964 = vmatpush.xpose.msk.msra.mxu1 %vm625_vm1, %v2487_v7  ;;  %1957 = vmatpush.xpose.msk.msrb.mxu3 %vm625_vm1, %v2487_v7 }
 0x143   : > { %1971 = vmatpush.xpose.msk.msra.mxu0 %vm625_vm1, %v2487_v7  ;;  %880 = vmatpush.msra.mxu2 %v2496_v9 }
 0x145   : > { %881 = vmatpush.msra.mxu2 %v2498_v10 }
 0x146   : > { %1965 = vmatpush.xpose.msk.msra.mxu1 %vm625_vm1, %v2494_v8  ;;  %1958 = vmatpush.xpose.msk.msrb.mxu3 %vm625_vm1, %v2494_v8 }
 0x147   : > { %1972 = vmatpush.xpose.msk.msra.mxu0 %vm625_vm1, %v2494_v8  ;;  %830 = vrot.lane.b32.xlu1 %v2457_v60, %s2189_s23 }
 0x14f   : > { %903 = vrot.lane.b32.xlu1 %v2457_v60, %s2191_s29 }
 0x199   : > { %v2546_v12 = vpop.permute.xlu1 %915 }
 0x19a   : > { %1989 = vmatpush.xpose.msk.msrb.mxu1 %vm625_vm1, %v2546_v12 }
 0x1a1   : > { %v2550_v13 = vpop.permute.xlu1 %913 }
 0x1a2   : > { %1990 = vmatpush.xpose.msk.msrb.mxu1 %vm625_vm1, %v2550_v13 }
 0x1a9   : > { %v765_v14 = vpop.permute.xlu1 %764 }
 0x1aa   : > { %1966 = vmatmul.msk.f32.vlgmr.msra.gmra.mxu1 %vm625_vm1, %v765_v14 }
 0x1b1   : > { %v2561_v15 = vpop.permute.xlu1 %911 }
 0x1b2   : > { %1991 = vmatpush.xpose.msk.msrb.mxu1 %vm625_vm1, %v2561_v15 }
 0x1b6   : > { %v658_v17 = vpop.f32.mrf.mxu1 }
 0x1b7   : > { %v659_v18 = vadd.f32 %v658_v17, %v2566_v16 }
 0x1b9   : > { %v661_v19 = vsel %vm587_vm0, %v659_v18, -inf  ;;  %v831_v25 = vpop.permute.xlu1 %830 }
 0x1ba   : > { %662 = vmax.xlane.f32.xlu2 %v661_v19 }
 0x1c1   : > { %v904_v26 = vpop.permute.xlu1 %903 }
 0x1d2   : > { %909 = vrot.lane.b32.xlu2 %v2494_v8, %s2191_s29 }
 0x227   : > { %v785_v33 = vpop.f32.mrf.mxu1 }
 0x228   : > { %v786_v34 = vadd.f32 %v2598_v32, %v785_v33 }
 0x22a   : > { %v788_v37 = vsel %vm587_vm0, %v786_v34, -inf }
 0x22d   : > { %v663_v20 = vpop.xlane.xlu2 %662 }
 0x22e   : > { %v664_v21 = vsub.f32 %v659_v18, %v663_v20 }
 0x230   : > { %v665_v22 = vmul.f32 1.442695, %v664_v21 }
 0x232   : > { %2116 = vpow2.f32 %v665_v22 }
 0x235   : > { %v2572_v23 = vpop.permute.xlu2 %909 }
 0x236   : > { %1992 = vmatpush.xpose.msk.msrb.mxu1 %vm625_vm1, %v2572_v23 }
 0x238   : > { %v2576_v24 = vpop.eup %2116 }
 0x239   : > { %1953 = vmatmul.msk.f32.vlgmr.msra.gmra.mxu3 %vm587_vm0, %v2576_v24 }
 0x23a   : > { %1975 = vmatpush.xpose.msk.msra.mxu3 %vm625_vm1, %v2546_v12 }
 0x23e   : > { %1976 = vmatpush.xpose.msk.msra.mxu3 %vm625_vm1, %v2550_v13 }
 0x241   : > { %1959 = vmatmul.msk.f32.vlgmr.msrb.gmra.mxu3 %vm625_vm1, %v699_v11 }
 0x242   : > { %1977 = vmatpush.xpose.msk.msra.mxu3 %vm625_vm1, %v2561_v15 }
 0x246   : > { %1978 = vmatpush.xpose.msk.msra.mxu3 %vm625_vm1, %v2572_v23 }
 0x249   : > { %1979 = vmatmul.msk.f32.vlgmr.msra.gmra.mxu3 %vm625_vm1, %v904_v26 }
 0x2bc   : > { %v2590_v27 = vpop.f32.mrf.mxu3 }
 0x2c4   : > { %v719_v29 = vpop.f32.mrf.mxu3 }
 0x2c5   : > { %v720_v30 = vadd.f32 %v2593_v28, %v719_v29 }
 0x2c7   : > { %v722_v31 = vsel %vm587_vm0, %v720_v30, -inf }
 0x2c8   : > { %723 = vmax.xlane.f32.xlu0 %v722_v31 }
 0x2cc   : > { %v944_v35 = vpop.f32.mrf.mxu3 }
 0x2cd   : > { %v945_v36 = vadd.f32 %v944_v35, %v2566_v16 }
 0x2cf   : > { %v947_v38 = vsel %vm587_vm0, %v945_v36, -inf }
 0x2d0   : > { %789 = vmax.xlane.f32.xlu0 %v788_v37  ;;  %948 = vmax.xlane.f32.xlu2 %v947_v38 }
 0x2e4   : > { %2083 = vrot.lane.b32.xlu0 %v2606_v39, %s2191_s29 }
 0x2e8   : > { %1134 = vrot.lane.b32.xlu2 %v2457_v60, %s2192_s22 }
 0x2ec   : > { %2088 = vrot.lane.b32.xlu0 %v2614_v40, %s2191_s29 }
 0x2f4   : > { %1004 = vrot.lane.b32.xlu0 %v2457_v60, %s2193_s16 }
 0x33b   : > { %v724_v41 = vpop.xlane.xlu0 %723 }
 0x33c   : > { %v725_v42 = vsub.f32 %v720_v30, %v724_v41 }
 0x33e   : > { %v726_v43 = vmul.f32 1.442695, %v725_v42 }
 0x340   : > { %2118 = vpow2.f32 %v726_v43 }
 0x343   : > { %v790_v44 = vpop.xlane.xlu0 %789  ;;  %v949_v63 = vpop.xlane.xlu2 %948 }
 0x344   : > { %v791_v45 = vsub.f32 %v786_v34, %v790_v44  ;;  %v950_v1 = vsub.f32 %v945_v36, %v949_v63 }
 0x346   : > { %v2620_v46 = vpop.eup %2118  ;;  %v792_v47 = vmul.f32 1.442695, %v791_v45  ;;  %v951_v3 = vmul.f32 1.442695, %v950_v1 }
 0x347   : > { %1960 = vmatmul.msk.f32.vlgmr.msrb.gmra.mxu0 %vm587_vm0, %v2620_v46 }
 0x348   : > { %2120 = vpow2.f32 %v792_v47 }
 0x34b   : > { %v1135_v21 = vpop.permute.xlu2 %1134 }
 0x34e   : > { %v2624_v48 = vpop.eup %2120 }
 0x34f   : > { %1967 = vmatmul.msk.f32.vlgmr.msrb.gmra.mxu2 %vm587_vm0, %v2624_v48  ;;  %1973 = vmatmul.msk.f32.vlgmr.msra.gmra.mxu0 %vm625_vm1, %v831_v25 }
 0x356   : > { %v2084_v49 = vpop.permute.xlu0 %2083 }
 0x357   : > { %v2085_v50 = vunpack.i.l.bf16 %v2084_v49  ;;  %v2086_v51 = vunpack.i.h.bf16 %v2084_v49 }
 0x359   : > { %987 = vmatpush.msrb.mxu2 %v2085_v50  ;;  %1052 = vmatpush.msrb.mxu0 %v2085_v50 }
 0x35a   : > { %1117 = vmatpush.msrb.mxu3 %v2085_v50 }
 0x35b   : > { %988 = vmatpush.msrb.mxu2 %v2086_v51  ;;  %1053 = vmatpush.msrb.mxu0 %v2086_v51 }
 0x35c   : > { %1118 = vmatpush.msrb.mxu3 %v2086_v51 }
 0x35e   : > { %v2089_v52 = vpop.permute.xlu0 %2088 }
 0x35f   : > { %v2090_v53 = vunpack.i.l.bf16 %v2089_v52  ;;  %v2091_v54 = vunpack.i.h.bf16 %v2089_v52 }
 0x361   : > { %989 = vmatpush.msrb.mxu2 %v2090_v53  ;;  %1054 = vmatpush.msrb.mxu0 %v2090_v53 }
 0x362   : > { %1119 = vmatpush.msrb.mxu3 %v2090_v53 }
 0x363   : > { %990 = vmatpush.msrb.mxu2 %v2091_v54  ;;  %1055 = vmatpush.msrb.mxu0 %v2091_v54 }
 0x364   : > { %1120 = vmatpush.msrb.mxu3 %v2091_v54 }
 0x365   : > { %1996 = vmatpush.xpose.msk.msra.mxu0 %vm625_vm1, %v2546_v12 }
 0x366   : > { %v1005_v10 = vpop.permute.xlu0 %1004 }
 0x369   : > { %1997 = vmatpush.xpose.msk.msra.mxu0 %vm625_vm1, %v2550_v13 }
 0x36d   : > { %1998 = vmatpush.xpose.msk.msra.mxu0 %vm625_vm1, %v2561_v15 }
 0x371   : > { %1999 = vmatpush.xpose.msk.msra.mxu0 %vm625_vm1, %v2572_v23 }
 0x3c4   : > { %v2637_v55 = vpop.f32.mrf.mxu0 }
 0x3cc   : > { %v851_v57 = vpop.f32.mrf.mxu0 }
 0x3cd   : > { %v852_v58 = vadd.f32 %v2640_v56, %v851_v57 }
 0x3cf   : > { %v854_v59 = vsel %vm587_vm0, %v852_v58, -inf }
 0x3d0   : > { %855 = vmax.xlane.f32.xlu1 %v854_v59 }
 0x3d2   : > { %v2664_v11 = vpop.f32.mrf.mxu2 }
 0x3e9   : > { %1069 = vrot.lane.b32.xlu1 %v2457_v60, %s2194_s17 }
 0x443   : > { %v856_v61 = vpop.xlane.xlu1 %855 }
 0x444   : > { %v857_v62 = vsub.f32 %v852_v58, %v856_v61 }
 0x446   : > { %v858_v0 = vmul.f32 1.442695, %v857_v62 }
 0x448   : > { %2122 = vpow2.f32 %v858_v0 }
 0x449   : > { %2124 = vpow2.f32 %v951_v3 }
 0x44e   : > { %v2646_v5 = vpop.eup %2122 }
 0x44f   : > { %1974 = vmatmul.msk.f32.vlgmr.msra.gmra.mxu2 %vm587_vm0, %v2646_v5  ;;  %v2654_v6 = vpop.eup %2124 }
 0x450   : > { %1982 = vmatpush.xpose.msk.msra.mxu2 %vm625_vm1, %v2546_v12 }
 0x454   : > { %1983 = vmatpush.xpose.msk.msra.mxu2 %vm625_vm1, %v2550_v13 }
 0x457   : > { %1980 = vmatmul.msk.f32.vlgmr.msrb.gmra.mxu2 %vm587_vm0, %v2654_v6 }
 0x458   : > { %1984 = vmatpush.xpose.msk.msra.mxu2 %vm625_vm1, %v2561_v15 }
 0x45b   : > { %v1070_v9 = vpop.permute.xlu1 %1069 }
 0x45c   : > { %1985 = vmatpush.xpose.msk.msra.mxu2 %vm625_vm1, %v2572_v23  ;;  %1993 = vmatmul.msk.f32.vlgmr.msrb.gmra.mxu1 %vm625_vm1, %v1070_v9 }
 0x45f   : > { %1986 = vmatmul.msk.f32.vlgmr.msra.gmra.mxu2 %vm625_vm1, %v1005_v10 }
 0x460   : > { %1182 = vmatpush.msrb.mxu2 %v2085_v50 }
 0x462   : > { %1183 = vmatpush.msrb.mxu2 %v2086_v51 }
 0x464   : > { %1184 = vmatpush.msrb.mxu2 %v2090_v53 }
 0x466   : > { %1185 = vmatpush.msrb.mxu2 %v2091_v54 }
 0x4d2   : > { %v2666_v12 = vpop.f32.mrf.mxu2 }
 0x4d9   : > { %v1090_v13 = vpop.f32.mrf.mxu1 }
 0x4da   : > { %v1091_v14 = vadd.f32 %v2598_v32, %v1090_v13  ;;  %v2669_v15 = vpop.f32.mrf.mxu2 }
 0x4dc   : > { %v1093_v17 = vsel %vm587_vm0, %v1091_v14, -inf }
 0x4dd   : > { %1094 = vmax.xlane.f32.xlu2 %v1093_v17 }
 0x4e2   : > { %v1025_v18 = vpop.f32.mrf.mxu2 }
 0x4e3   : > { %v1026_v19 = vadd.f32 %v2593_v28, %v1025_v18 }
 0x4e5   : > { %v1028_v20 = vsel %vm587_vm0, %v1026_v19, -inf }
 0x4e6   : > { %1029 = vmax.xlane.f32.xlu0 %v1028_v20 }
 0x4f5   : > { %1215 = vrot.lane.b32.xlu2 %v2487_v7, %s2195_s18 }
 0x4fa   : > { %1219 = vrot.lane.b32.xlu0 %v2466_v2, %s2195_s18 }
 0x502   : > { %1217 = vrot.lane.b32.xlu0 %v2473_v4, %s2195_s18 }
 0x50a   : > { %1213 = vrot.lane.b32.xlu0 %v2494_v8, %s2195_s18 }
 0x512   : > { %1308 = vrot.lane.b32.xlu0 %v2457_v60, %s2196_s20 }
 0x550   : > { %v1095_v22 = vpop.xlane.xlu2 %1094 }
 0x551   : > { %v1096_v23 = vsub.f32 %v1091_v14, %v1095_v22 }
 0x553   : > { %v1097_v25 = vmul.f32 1.442695, %v1096_v23 }
 0x555   : > { %2126 = vpow2.f32 %v1097_v25 }
 0x558   : > { %v1216_v36 = vpop.permute.xlu2 %1215 }
 0x559   : > { %v1030_v26 = vpop.xlane.xlu0 %1029 }
 0x55a   : > { %v1031_v30 = vsub.f32 %v1026_v19, %v1030_v26 }
 0x55b   : > { %v2684_v29 = vpop.eup %2126 }
 0x55c   : > { %1994 = vmatmul.msk.f32.vlgmr.msrb.gmra.mxu3 %vm587_vm0, %v2684_v29  ;;  %v1032_v31 = vmul.f32 1.442695, %v1031_v30 }
 0x55e   : > { %2128 = vpow2.f32 %v1032_v31 }
 0x564   : > { %v2688_v33 = vpop.eup %2128 }
 0x565   : > { %1987 = vmatmul.msk.f32.vlgmr.msrb.gmra.mxu0 %vm587_vm0, %v2688_v33 }
 0x56c   : > { %v1220_v34 = vpop.permute.xlu0 %1219 }
 0x56d   : > { %2000 = vmatmul.msk.f32.vlgmr.msra.gmra.mxu0 %vm625_vm1, %v1135_v21  ;;  %2002 = vmatpush.xpose.msk.msra.mxu3 %vm625_vm1, %v1220_v34 }
 0x56e   : > { %2009 = vmatpush.xpose.msk.msra.mxu2 %vm625_vm1, %v1220_v34 }
 0x574   : > { %v1218_v35 = vpop.permute.xlu0 %1217 }
 0x575   : > { %2003 = vmatpush.xpose.msk.msra.mxu3 %vm625_vm1, %v1218_v35  ;;  %2010 = vmatpush.xpose.msk.msra.mxu2 %vm625_vm1, %v1218_v35 }
 0x579   : > { %2004 = vmatpush.xpose.msk.msra.mxu3 %vm625_vm1, %v1216_v36  ;;  %2011 = vmatpush.xpose.msk.msra.mxu2 %vm625_vm1, %v1216_v36 }
 0x57c   : > { %v1214_v37 = vpop.permute.xlu0 %1213 }
 0x57d   : > { %2005 = vmatpush.xpose.msk.msra.mxu3 %vm625_vm1, %v1214_v37  ;;  %2012 = vmatpush.xpose.msk.msra.mxu2 %vm625_vm1, %v1214_v37 }
 0x584   : > { %v1309_v50 = vpop.permute.xlu0 %1308 }
 0x5df   : > { %v2731_v62 = vpop.f32.mrf.mxu3 }
 0x5e2   : > { %v2701_v38 = vpop.f32.mrf.mxu0 }
 0x5ea   : > { %v1155_v41 = vpop.f32.mrf.mxu0 }
 0x5eb   : > { %v1156_v42 = vadd.f32 %v2640_v56, %v1155_v41 }
 0x5ed   : > { %v1158_v43 = vsel %vm587_vm0, %v1156_v42, -inf }
 0x5ee   : > { %1159 = vmax.xlane.f32.xlu1 %v1158_v43 }
 0x607   : > { %1207 = vrot.lane.b32.xlu1 %v2457_v60, %s2195_s18 }
 0x60f   : > { %2093 = vrot.lane.b32.xlu1 %v2606_v39, %s2195_s18 }
 0x617   : > { %2098 = vrot.lane.b32.xlu1 %v2614_v40, %s2195_s18 }
 0x61f   : > { %1373 = vrot.lane.b32.xlu1 %v2457_v60, %s2197_s24 }
 0x627   : > { %1438 = vrot.lane.b32.xlu1 %v2457_v60, %s2198_s26 }
 0x661   : > { %v1160_v44 = vpop.xlane.xlu1 %1159 }
 0x662   : > { %v1161_v45 = vsub.f32 %v1156_v42, %v1160_v44 }
 0x664   : > { %v1162_v47 = vmul.f32 1.442695, %v1161_v45 }
 0x666   : > { %2130 = vpow2.f32 %v1162_v47 }
 0x66c   : > { %v2715_v49 = vpop.eup %2130 }
 0x66d   : > { %2001 = vmatmul.msk.f32.vlgmr.msrb.gmra.mxu2 %vm587_vm0, %v2715_v49 }
 0x675   : > { %2013 = vmatmul.msk.f32.vlgmr.msra.gmra.mxu2 %vm625_vm1, %v1309_v50 }
 0x679   : > { %v1208_v51 = vpop.permute.xlu1 %1207 }
 0x67a   : > { %2006 = vmatmul.msk.f32.vlgmr.msra.gmra.mxu3 %vm625_vm1, %v1208_v51 }
 0x681   : > { %v2094_v52 = vpop.permute.xlu1 %2093 }
 0x682   : > { %v2095_v53 = vunpack.i.l.bf16 %v2094_v52  ;;  %v2096_v54 = vunpack.i.h.bf16 %v2094_v52 }
 0x684   : > { %1291 = vmatpush.msra.mxu1 %v2095_v53  ;;  %1356 = vmatpush.msrb.mxu0 %v2095_v53 }
 0x685   : > { %1421 = vmatpush.msrb.mxu3 %v2095_v53  ;;  %1486 = vmatpush.msrb.mxu2 %v2095_v53 }
 0x686   : > { %1292 = vmatpush.msra.mxu1 %v2096_v54  ;;  %1357 = vmatpush.msrb.mxu0 %v2096_v54 }
 0x687   : > { %1422 = vmatpush.msrb.mxu3 %v2096_v54  ;;  %1487 = vmatpush.msrb.mxu2 %v2096_v54 }
 0x689   : > { %v2099_v57 = vpop.permute.xlu1 %2098 }
 0x68a   : > { %v2100_v58 = vunpack.i.l.bf16 %v2099_v57  ;;  %v2101_v59 = vunpack.i.h.bf16 %v2099_v57 }
 0x68c   : > { %1293 = vmatpush.msra.mxu1 %v2100_v58  ;;  %1358 = vmatpush.msrb.mxu0 %v2100_v58 }
 0x68d   : > { %1423 = vmatpush.msrb.mxu3 %v2100_v58  ;;  %1488 = vmatpush.msrb.mxu2 %v2100_v58 }
 0x68e   : > { %1294 = vmatpush.msra.mxu1 %v2101_v59  ;;  %1359 = vmatpush.msrb.mxu0 %v2101_v59 }
 0x68f   : > { %1424 = vmatpush.msrb.mxu3 %v2101_v59  ;;  %1489 = vmatpush.msrb.mxu2 %v2101_v59 }
 0x690   : > { %2016 = vmatpush.xpose.msk.msrb.mxu1 %vm625_vm1, %v1220_v34  ;;  %2023 = vmatpush.xpose.msk.msra.mxu0 %vm625_vm1, %v1220_v34 }
 0x691   : > { %v1374_v20 = vpop.permute.xlu1 %1373 }
 0x694   : > { %2017 = vmatpush.xpose.msk.msrb.mxu1 %vm625_vm1, %v1218_v35  ;;  %2024 = vmatpush.xpose.msk.msra.mxu0 %vm625_vm1, %v1218_v35 }
 0x698   : > { %2018 = vmatpush.xpose.msk.msrb.mxu1 %vm625_vm1, %v1216_v36  ;;  %2025 = vmatpush.xpose.msk.msra.mxu0 %vm625_vm1, %v1216_v36 }
 0x699   : > { %v1439_v23 = vpop.permute.xlu1 %1438 }
 0x69c   : > { %2019 = vmatpush.xpose.msk.msrb.mxu1 %vm625_vm1, %v1214_v37  ;;  %2026 = vmatpush.xpose.msk.msra.mxu0 %vm625_vm1, %v1214_v37 }
 0x6f0   : > { %v2729_v61 = vpop.f32.mrf.mxu2 }
 0x6f8   : > { %v1329_v63 = vpop.f32.mrf.mxu2 }
 0x6f9   : > { %v1330_v0 = vadd.f32 %v2593_v28, %v1329_v63 }
 0x6fb   : > { %v1332_v1 = vsel %vm587_vm0, %v1330_v0, -inf }
 0x6fc   : > { %1333 = vmax.xlane.f32.xlu2 %v1332_v1 }
 0x6fd   : > { %v1248_v3 = vpop.f32.mrf.mxu3 }
 0x6fe   : > { %v1249_v9 = vadd.f32 %v1248_v3, %v2566_v16 }
 0x700   : > { %v1251_v10 = vsel %vm587_vm0, %v1249_v9, -inf }
 0x701   : > { %1252 = vmax.xlane.f32.xlu0 %v1251_v10 }
 0x714   : > { %1523 = vrot.lane.b32.xlu2 %v2466_v2, %s2199_s27 }
 0x71c   : > { %1517 = vrot.lane.b32.xlu2 %v2494_v8, %s2199_s27 }
 0x724   : > { %1612 = vrot.lane.b32.xlu2 %v2457_v60, %s2200_s30 }
 0x72c   : > { %2103 = vrot.lane.b32.xlu2 %v2606_v39, %s2199_s27 }
 0x734   : > { %1677 = vrot.lane.b32.xlu2 %v2457_v60, %s2201_s13 }
 0x73c   : > { %1742 = vrot.lane.b32.xlu2 %v2457_v60, %s2202_s14 }
 0x76f   : > { %v1334_v13 = vpop.xlane.xlu2 %1333 }
 0x770   : > { %v1335_v2 = vsub.f32 %v1330_v0, %v1334_v13  ;;  %v728_v13 = vsel %vm587_vm0, %v2620_v46, 0.0 }
 0x772   : > { %v1336_v14 = vmul.f32 1.442695, %v1335_v2  ;;  %v794_v2 = vsel %vm587_vm0, %v2624_v48, 0.0 }
 0x774   : > { %2132 = vpow2.f32 %v1336_v14  ;;  %v1253_v8 = vpop.xlane.xlu0 %1252  ;;  %v1164_v14 = vsel %vm587_vm0, %v2715_v49, 0.0  ;;  %v667_v49 = vsel %vm587_vm0, %v2576_v24, 0.0 }
 0x775   : > { %v1254_v17 = vsub.f32 %v1249_v9, %v1253_v8 }
 0x777   : > { %v1255_v18 = vmul.f32 1.442695, %v1254_v17  ;;  %v2749_v19 = vpop.permute.xlu2 %1523 }
 0x778   : > { %2029 = vmatpush.xpose.msk.msra.mxu3 %vm625_vm1, %v2749_v19  ;;  %2036 = vmatpush.xpose.msk.msra.mxu2 %vm625_vm1, %v2749_v19 }
 0x779   : > { %2134 = vpow2.f32 %v1255_v18 }
 0x77a   : > { %v2755_v39 = vpop.eup %2132 }
 0x77b   : > { %2014 = vmatmul.msk.f32.vlgmr.msrb.gmra.mxu0 %vm587_vm0, %v2755_v39 }
 0x77f   : > { %v2759_v21 = vpop.eup %2134  ;;  %v2761_v22 = vpop.permute.xlu2 %1517 }
 0x780   : > { %2007 = vmatmul.msk.f32.vlgmr.msra.gmra.mxu1 %vm587_vm0, %v2759_v21 }
 0x783   : > { %2027 = vmatmul.msk.f32.vlgmr.msra.gmra.mxu0 %vm625_vm1, %v1439_v23 }
 0x787   : > { %v1613_v25 = vpop.permute.xlu2 %1612 }
 0x788   : > { %2020 = vmatmul.msk.f32.vlgmr.msrb.gmra.mxu1 %vm625_vm1, %v1374_v20 }
 0x78f   : > { %v2104_v26 = vpop.permute.xlu2 %2103 }
 0x790   : > { %v2105_v30 = vunpack.i.l.bf16 %v2104_v26  ;;  %v2106_v31 = vunpack.i.h.bf16 %v2104_v26 }
 0x792   : > { %1595 = vmatpush.msra.mxu1 %v2105_v30  ;;  %1660 = vmatpush.msrb.mxu0 %v2105_v30 }
 0x794   : > { %1596 = vmatpush.msra.mxu1 %v2106_v31  ;;  %1661 = vmatpush.msrb.mxu0 %v2106_v31 }
 0x7f8   : > { %v2767_v34 = vpop.f32.mrf.mxu0 }
 0x7fd   : > { %v2769_v35 = vpop.f32.mrf.mxu1 }
 0x800   : > { %v1459_v36 = vpop.f32.mrf.mxu0 }
 0x801   : > { %v1460_v37 = vadd.f32 %v2640_v56, %v1459_v36 }
 0x803   : > { %v1462_v41 = vsel %vm587_vm0, %v1460_v37, -inf }
 0x804   : > { %1463 = vmax.xlane.f32.xlu1 %v1462_v41  ;;  %v1678_v41 = vpop.permute.xlu2 %1677 }
 0x805   : > { %v1394_v42 = vpop.f32.mrf.mxu1 }
 0x806   : > { %v1395_v43 = vadd.f32 %v2598_v32, %v1394_v42 }
 0x808   : > { %v1397_v44 = vsel %vm587_vm0, %v1395_v43, -inf }
 0x809   : > { %1398 = vmax.xlane.f32.xlu0 %v1397_v44 }
 0x81d   : > { %1521 = vrot.lane.b32.xlu0 %v2473_v4, %s2199_s27 }
 0x825   : > { %1519 = vrot.lane.b32.xlu0 %v2487_v7, %s2199_s27 }
 0x82d   : > { %1511 = vrot.lane.b32.xlu0 %v2457_v60, %s2199_s27 }
 0x877   : > { %v1464_v45 = vpop.xlane.xlu1 %1463 }
 0x878   : > { %v1465_v47 = vsub.f32 %v1460_v37, %v1464_v45 }
 0x87a   : > { %v1466_v50 = vmul.f32 1.442695, %v1465_v47 }
 0x87c   : > { %2136 = vpow2.f32 %v1466_v50  ;;  %v1399_v51 = vpop.xlane.xlu0 %1398 }
 0x87d   : > { %v1400_v52 = vsub.f32 %v1395_v43, %v1399_v51 }
 0x87f   : > { %v1401_v53 = vmul.f32 1.442695, %v1400_v52 }
 0x881   : > { %2138 = vpow2.f32 %v1401_v53 }
 0x882   : > { %v2781_v54 = vpop.eup %2136 }
 0x883   : > { %2028 = vmatmul.msk.f32.vlgmr.msrb.gmra.mxu2 %vm587_vm0, %v2781_v54 }
 0x887   : > { %v2139_v4 = vpop.eup %2138 }
 0x888   : > { %2021 = vmatmul.msk.f32.vlgmr.msrb.gmra.mxu3 %vm587_vm0, %v2139_v4  ;;  %v1403_v46 = vsel %vm587_vm0, %v2139_v4, 0.0 }
 0x88f   : > { %v2786_v7 = vpop.permute.xlu0 %1521 }
 0x890   : > { %2030 = vmatpush.xpose.msk.msra.mxu3 %vm625_vm1, %v2786_v7  ;;  %2037 = vmatpush.xpose.msk.msra.mxu2 %vm625_vm1, %v2786_v7 }
 0x897   : > { %v2792_v60 = vpop.permute.xlu0 %1519 }
 0x898   : > { %2031 = vmatpush.xpose.msk.msra.mxu3 %vm625_vm1, %v2792_v60  ;;  %2038 = vmatpush.xpose.msk.msra.mxu2 %vm625_vm1, %v2792_v60 }
 0x89c   : > { %2032 = vmatpush.xpose.msk.msra.mxu3 %vm625_vm1, %v2761_v22  ;;  %2039 = vmatpush.xpose.msk.msra.mxu2 %vm625_vm1, %v2761_v22 }
 0x89f   : > { %2040 = vmatmul.msk.f32.vlgmr.msra.gmra.mxu2 %vm625_vm1, %v1613_v25  ;;  %v1512_v57 = vpop.permute.xlu0 %1511 }
 0x8a0   : > { %1725 = vmatpush.msrb.mxu3 %v2105_v30  ;;  %1790 = vmatpush.msrb.mxu2 %v2105_v30 }
 0x8a1   : > { %2033 = vmatmul.msk.f32.vlgmr.msra.gmra.mxu3 %vm625_vm1, %v1512_v57 }
 0x8a2   : > { %1726 = vmatpush.msrb.mxu3 %v2106_v31  ;;  %1791 = vmatpush.msrb.mxu2 %v2106_v31 }
 0x906   : > { %v2804_v58 = vpop.f32.mrf.mxu2 }
 0x90b   : > { %v2806_v59 = vpop.f32.mrf.mxu3 }
 0x922   : > { %v1633_v63 = vpop.f32.mrf.mxu2 }
 0x923   : > { %v1634_v0 = vadd.f32 %v2593_v28, %v1633_v63  ;;  %v860_v28 = vsel %vm587_vm0, %v2646_v5, 0.0 }
 0x924   : > { %v1552_v1 = vpop.f32.mrf.mxu3 }
 0x925   : > { %v1553_v3 = vadd.f32 %v1552_v1, %v2566_v16  ;;  %v1636_v9 = vsel %vm587_vm0, %v1634_v0, -inf  ;;  %v953_v16 = vsel %vm587_vm0, %v2654_v6, 0.0 }
 0x926   : > { %1637 = vmax.xlane.f32.xlu0 %v1636_v9  ;;  %v1338_v9 = vsel %vm587_vm0, %v2755_v39, 0.0 }
 0x927   : > { %v1555_v10 = vsel %vm587_vm0, %v1553_v3, -inf }
 0x928   : > { %1556 = vmax.xlane.f32.xlu1 %v1555_v10  ;;  %v1468_v10 = vsel %vm587_vm0, %v2781_v54, 0.0 }
 0x92e   : > { %729 = vadd.xlane.f32.xlu0 %v728_v13 }
 0x936   : > { %795 = vadd.xlane.f32.xlu0 %v794_v2 }
 0x93e   : > { %861 = vadd.xlane.f32.xlu0 %v860_v28 }
 0x941   : > { %2108 = vrot.lane.b32.xlu1 %v2614_v40, %s2199_s27 }
 0x946   : > { %954 = vadd.xlane.f32.xlu0 %v953_v16 }
 0x94e   : > { %1165 = vadd.xlane.f32.xlu0 %v1164_v14 }
 0x956   : > { %1404 = vadd.xlane.f32.xlu0 %v1403_v46 }
 0x999   : > { %v1638_v48 = vpop.xlane.xlu0 %1637 }
 0x99a   : > { %v1639_v8 = vsub.f32 %v1634_v0, %v1638_v48 }
 0x99b   : > { %v1557_v20 = vpop.xlane.xlu1 %1556 }
 0x99c   : > { %v1640_v17 = vmul.f32 1.442695, %v1639_v8  ;;  %v1558_v6 = vsub.f32 %v1553_v3, %v1557_v20  ;;  %v1099_v3 = vsel %vm587_vm0, %v2684_v29, 0.0 }
 0x99e   : > { %2140 = vpow2.f32 %v1640_v17  ;;  %v1559_v25 = vmul.f32 1.442695, %v1558_v6 }
 0x9a0   : > { %2142 = vpow2.f32 %v1559_v25 }
 0x9a1   : > { %v2825_v5 = vpop.xlane.xlu0 %729 }
 0x9a4   : > { %v2141_v18 = vpop.eup %2140 }
 0x9a5   : > { %v1642_v40 = vsel %vm587_vm0, %v2141_v18, 0.0 }
 0x9a6   : > { %1643 = vadd.xlane.f32.xlu0 %v1642_v40  ;;  %v2143_v37 = vpop.eup %2142 }
 0x9a9   : > { %v2828_v23 = vpop.xlane.xlu0 %795 }
 0x9ae   : > { %668 = vadd.xlane.f32.xlu0 %v667_v49 }
 0x9b1   : > { %v862_v31 = vpop.xlane.xlu0 %861 }
 0x9b2   : > { %2144 = vrcp.f32 %v862_v31 }
 0x9b3   : > { %v2109_v26 = vpop.permute.xlu1 %2108 }
 0x9b4   : > { %v2110_v30 = vunpack.i.l.bf16 %v2109_v26  ;;  %v2111_v36 = vunpack.i.h.bf16 %v2109_v26 }
 0x9b6   : > { %1597 = vmatpush.msra.mxu1 %v2110_v30  ;;  %1662 = vmatpush.msrb.mxu0 %v2110_v30 }
 0x9b7   : > { %1727 = vmatpush.msrb.mxu3 %v2110_v30  ;;  %1792 = vmatpush.msrb.mxu2 %v2110_v30 }
 0x9b8   : > { %1598 = vmatpush.msra.mxu1 %v2111_v36  ;;  %1663 = vmatpush.msrb.mxu0 %v2111_v36  ;;  %v2145_v24 = vpop.eup %2144 }
 0x9b9   : > { %1728 = vmatpush.msrb.mxu3 %v2111_v36  ;;  %1793 = vmatpush.msrb.mxu2 %v2111_v36  ;;  %v887_v42 = vmul.f32 %v2145_v24, %v2666_v12  ;;  %v2854_v12 = vpop.xlane.xlu0 %954 }
 0x9ba   : > { %2034 = vmatmul.msk.f32.vlgmr.msra.gmra.mxu1 %vm587_vm0, %v2143_v37  ;;  %2041 = vmatmul.msk.f32.vlgmr.msrb.gmra.mxu0 %vm587_vm0, %v2141_v18 }
 0x9bb   : > { %2043 = vmatpush.xpose.msk.msrb.mxu1 %vm625_vm1, %v2749_v19  ;;  %2050 = vmatpush.xpose.msk.msra.mxu0 %vm625_vm1, %v2749_v19  ;;  %v1743_v19 = vpop.permute.xlu2 %1742 }
 0x9bf   : > { %2044 = vmatpush.xpose.msk.msrb.mxu1 %vm625_vm1, %v2786_v7  ;;  %2051 = vmatpush.xpose.msk.msra.mxu0 %vm625_vm1, %v2786_v7 }
 0x9c1   : > { %v2856_v43 = vpop.xlane.xlu0 %1165 }
 0x9c2   : > { %889 = vrot.lane.b32.xlu0 %v887_v42, %s2188_s19 }
 0x9c3   : > { %2045 = vmatpush.xpose.msk.msrb.mxu1 %vm625_vm1, %v2792_v60  ;;  %2052 = vmatpush.xpose.msk.msra.mxu0 %vm625_vm1, %v2792_v60 }
 0x9c7   : > { %2046 = vmatpush.xpose.msk.msrb.mxu1 %vm625_vm1, %v2761_v22  ;;  %2053 = vmatpush.xpose.msk.msra.mxu0 %vm625_vm1, %v2761_v22 }
 0x9c9   : > { %v2858_v44 = vpop.xlane.xlu0 %1404 }
 0x9ca   : > { %2047 = vmatmul.msk.f32.vlgmr.msrb.gmra.mxu1 %vm625_vm1, %v1678_v41  ;;  %2054 = vmatmul.msk.f32.vlgmr.msra.gmra.mxu0 %vm625_vm1, %v1743_v19 }
 0xa19   : > { %v1644_v45 = vpop.xlane.xlu0 %1643 }
 0xa21   : > { %v669_v47 = vpop.xlane.xlu0 %668 }
 0xa22   : > { %2146 = vrcp.f32 %v669_v47 }
 0xa23   : > { %2148 = vrcp.f32 %v1644_v45 }
 0xa24   : > { %2150 = vrcp.f32 %v2828_v23 }
 0xa28   : > { %v2147_v50 = vpop.eup %2146 }
 0xa29   : > { %v694_v51 = vmul.f32 %v2147_v50, %v2590_v27  ;;  %v2149_v22 = vpop.eup %2148  ;;  %v1034_v27 = vsel %vm587_vm0, %v2688_v33, 0.0 }
 0xa2a   : > { %v2151_v29 = vpop.eup %2150 }
 0xa2b   : > { %695 = vst.msk [vmem:[#allocation4] sm:$0xff] %vm625_vm1, %v694_v51  ;;  %v821_v33 = vmul.f32 %v2151_v29, %v2664_v11  ;;  %v1817_v29 = vld [vmem:[%s2984_s10 + $0x50] sm:$0xff] }
 0xa34   : > { %v890_v19 = vpop.permute.xlu0 %889 }
 0xa37   : > { %v1665_v52 = vpop.f32.mrf.mxu0  ;;  %v2864_v4 = vpop.f32.mrf.mxu1 }
 0xa38   : > { %v2862_v53 = vmul.f32 %v2149_v22, %v1665_v52 }
 0xa47   : > { %v1698_v7 = vpop.f32.mrf.mxu1  ;;  %v1763_v60 = vpop.f32.mrf.mxu0 }
 0xa48   : > { %v1699_v57 = vadd.f32 %v2598_v32, %v1698_v7  ;;  %v1764_v63 = vadd.f32 %v2640_v56, %v1763_v60  ;;  %v1257_v32 = vsel %vm587_vm0, %v2759_v21, 0.0  ;;  %v1561_v56 = vsel %vm587_vm0, %v2143_v37, 0.0 }
 0xa4a   : > { %v1701_v0 = vsel %vm587_vm0, %v1699_v57, -inf  ;;  %v1766_v1 = vsel %vm587_vm0, %v1764_v63, -inf }
 0xa4b   : > { %1702 = vmax.xlane.f32.xlu2 %v1701_v0  ;;  %1767 = vmax.xlane.f32.xlu1 %v1766_v1 }
 0xa53   : > { %1035 = vadd.xlane.f32.xlu2 %v1034_v27  ;;  %1100 = vadd.xlane.f32.xlu1 %v1099_v3  ;;  %v1822_v3 = vld [vmem:[%s2984_s10 + $0x78] sm:$0xff] }
 0xa54   : > { %1827 = vmatpush.msra.mxu3 %v1822_v3 }
 0xa5b   : > { %1339 = vadd.xlane.f32.xlu1 %v1338_v9  ;;  %1258 = vadd.xlane.f32.xlu2 %v1257_v32  ;;  %v1821_v9 = vld [vmem:[%s2984_s10 + $0x70] sm:$0xff]  ;;  %v1820_v32 = vld [vmem:[%s2984_s10 + $0x68] sm:$0xff] }
 0xa5c   : > { %1828 = vmatpush.msra.mxu3 %v1821_v9 }
 0xa5e   : > { %1829 = vmatpush.msra.mxu3 %v1820_v32 }
 0xa63   : > { %1562 = vadd.xlane.f32.xlu1 %v1561_v56  ;;  %1469 = vadd.xlane.f32.xlu2 %v1468_v10  ;;  %v1819_v56 = vld [vmem:[%s2984_s10 + $0x60] sm:$0xff]  ;;  %v1818_v10 = vld [vmem:[%s2984_s10 + $0x58] sm:$0xff] }
 0xa64   : > { %1830 = vmatpush.msra.mxu3 %v1819_v56 }
 0xa66   : > { %1831 = vmatpush.msra.mxu3 %v1818_v10 }
 0xa68   : > { %1832 = vmatpush.msra.mxu3 %v1817_v29 }
 0xa7c   : > { %823 = vrot.lane.b32.xlu1 %v821_v33, %s2190_s28  ;;  %v1816_v33 = vld [vmem:[%s2984_s10 + $0x48] sm:$0xff] }
 0xa7d   : > { %1833 = vmatpush.msra.mxu3 %v1816_v33 }
 0xabe   : > { %v1703_v39 = vpop.xlane.xlu2 %1702  ;;  %v1768_v13 = vpop.xlane.xlu1 %1767 }
 0xabf   : > { %v1704_v2 = vsub.f32 %v1699_v57, %v1703_v39  ;;  %v1769_v21 = vsub.f32 %v1764_v63, %v1768_v13  ;;  %v1815_v39 = vld [vmem:[%s2984_s10 + $0x40] sm:$0xff]  ;;  %v1814_v13 = vld [vmem:[%s2984_s10 + $0x38] sm:$0xff] }
 0xac0   : > { %1834 = vmatpush.msra.mxu3 %v1815_v39 }
 0xac1   : > { %v1705_v28 = vmul.f32 1.442695, %v1704_v2  ;;  %v1770_v16 = vmul.f32 1.442695, %v1769_v21  ;;  %v1813_v2 = vld [vmem:[%s2984_s10 + $0x30] sm:$0xff]  ;;  %v1812_v21 = vld [vmem:[%s2984_s10 + $0x28] sm:$0xff] }
 0xac2   : > { %1835 = vmatpush.msra.mxu3 %v1814_v13 }
 0xac3   : > { %2152 = vpow2.f32 %v1705_v28  ;;  %v1811_v28 = vld [vmem:[%s2984_s10 + $0x20] sm:$0xff] }
 0xac4   : > { %2154 = vpow2.f32 %v1770_v16  ;;  %1836 = vmatpush.msra.mxu3 %v1813_v2 }
 0xac6   : > { %v1036_v14 = vpop.xlane.xlu2 %1035  ;;  %v1101_v46 = vpop.xlane.xlu1 %1100  ;;  %1837 = vmatpush.msra.mxu3 %v1812_v21 }
 0xac7   : > { %2156 = vrcp.f32 %v1036_v14  ;;  %v1810_v14 = vld [vmem:[%s2984_s10 + $0x18] sm:$0xff] }
 0xac8   : > { %2158 = vrcp.f32 %v1101_v46  ;;  %1838 = vmatpush.msra.mxu3 %v1811_v28  ;;  %v1809_v46 = vld [vmem:[%s2984_s10 + $0x10] sm:$0xff] }
 0xac9   : > { %v2153_v54 = vpop.eup %2152 }
 0xaca   : > { %v2155_v48 = vpop.eup %2154  ;;  %2048 = vmatmul.msk.f32.vlgmr.msrb.gmra.mxu3 %vm587_vm0, %v2153_v54  ;;  %v1707_v11 = vsel %vm587_vm0, %v2153_v54, 0.0  ;;  %v1808_v54 = vld [vmem:[%s2984_s10 + $0x8] sm:$0xff] }
 0xacb   : > { %2055 = vmatmul.msk.f32.vlgmr.msrb.gmra.mxu2 %vm587_vm0, %v2155_v48  ;;  %1708 = vadd.xlane.f32.xlu2 %v1707_v11 }
 0xacc   : > { %1839 = vmatpush.msra.mxu3 %v1810_v14 }
 0xacd   : > { %v2157_v8 = vpop.eup %2156 }
 0xace   : > { %v2159_v17 = vpop.eup %2158  ;;  %v1340_v18 = vpop.xlane.xlu1 %1339  ;;  %v1061_v20 = vmul.f32 %v2157_v8, %v2701_v38  ;;  %1840 = vmatpush.msra.mxu3 %v1809_v46 }
 0xacf   : > { %v1259_v40 = vpop.xlane.xlu2 %1258  ;;  %2160 = vrcp.f32 %v1340_v18  ;;  %v1126_v6 = vmul.f32 %v2159_v17, %v2731_v62  ;;  %v2115_v17 = vld [vmem:[%s2985_s11] ss:$0 sm:$0xff] }
 0xad0   : > { %2162 = vrcp.f32 %v1259_v40  ;;  %1063 = vrot.lane.b32.xlu0 %v1061_v20, %s2201_s13  ;;  %1841 = vmatpush.msra.mxu3 %v1808_v54 }
 0xad1   : > { %1128 = vrot.lane.b32.xlu1 %v1126_v6, %s2200_s30  ;;  %2164 = vrcp.f32 %v2825_v5 }
 0xad5   : > { %v2161_v23 = vpop.eup %2160 }
 0xad6   : > { %v2163_v49 = vpop.eup %2162  ;;  %v1365_v26 = vmul.f32 %v2161_v23, %v2767_v34 }
 0xad7   : > { %v1470_v25 = vpop.xlane.xlu2 %1469  ;;  %v1300_v30 = vmul.f32 %v2163_v49, %v2769_v35  ;;  %v2165_v38 = vpop.eup %2164 }
 0xad8   : > { %2166 = vrcp.f32 %v1470_v25  ;;  %v755_v36 = vmul.f32 %v2165_v38, %v2637_v55  ;;  %v1772_v55 = vsel %vm587_vm0, %v2155_v48, 0.0  ;;  %v1807_v48 = vld [vmem:[%s2984_s10] sm:$0xff]  ;;  %vm1804_vm0 = vcmask 1048512  }
 0xad9   : > { %1367 = vrot.lane.b32.xlu1 %v1365_v26, %s2197_s24  ;;  %1302 = vrot.lane.b32.xlu0 %v1300_v30, %s2198_s26  ;;  %2168 = vrcp.f32 %v2854_v12 }
 0xada   : > { %2170 = vrcp.f32 %v2856_v43  ;;  %1842 = vmatpush.msra.mxu3 %v1807_v48 }
 0xadb   : > { %2172 = vrcp.f32 %v2858_v44 }
 0xade   : > { %v2167_v62 = vpop.eup %2166 }
 0xadf   : > { %v1495_v31 = vmul.f32 %v2167_v62, %v2804_v58  ;;  %v2169_v34 = vpop.eup %2168 }
 0xae0   : > { %v996_v35 = vmul.f32 %v2169_v34, %v2669_v15  ;;  %v2171_v5 = vpop.eup %2170  ;;  %v1563_v15 = vpop.xlane.xlu1 %1562 }
 0xae1   : > { %1497 = vrot.lane.b32.xlu0 %v1495_v31, %s2195_s18  ;;  %v1191_v58 = vmul.f32 %v2171_v5, %v2729_v61  ;;  %v2173_v37 = vpop.eup %2172  ;;  %2174 = vrcp.f32 %v1563_v15 }
 0xae2   : > { %v1430_v24 = vmul.f32 %v2173_v37, %v2806_v59 }
 0xae3   : > { %757 = vrot.lane.b32.xlu2 %v755_v36, %s2189_s23 }
 0xae7   : > { %v2175_v41 = vpop.eup %2174 }
 0xae8   : > { %v1604_v42 = vmul.f32 %v2175_v41, %v2864_v4 }
 0xaeb   : > { %998 = vrot.lane.b32.xlu2 %v996_v35, %s2202_s14 }
 0xaee   : > { %v824_v59 = vpop.permute.xlu1 %823 }
 0xaf3   : > { %1193 = vrot.lane.b32.xlu2 %v1191_v58, %s2199_s27 }
 0xafb   : > { %1432 = vrot.lane.b32.xlu2 %v1430_v24, %s2196_s20 }
 0xb03   : > { %1773 = vadd.xlane.f32.xlu1 %v1772_v55  ;;  %1671 = vrot.lane.b32.xlu2 %v2862_v53, %s2194_s17 }
 0xb1c   : > { %1606 = vrot.lane.b32.xlu1 %v1604_v42, %s2192_s22  ;;  %s462_s22 = scalar_lea.vmem %s2986_s12, %s2382_s25 }
 0xb3e   : > { %v1709_v61 = vpop.xlane.xlu2 %1708 }
 0xb3f   : > { %2176 = vrcp.f32 %v1709_v61 }
 0xb42   : > { %v1064_v43 = vpop.permute.xlu0 %1063 }
 0xb43   : > { %v1129_v47 = vpop.permute.xlu1 %1128 }
 0xb45   : > { %v2177_v44 = vpop.eup %2176 }
 0xb46   : > { %v758_v12 = vpop.permute.xlu2 %757 }
 0xb47   : > { %761 = vst.msk [vmem:[#allocation4] sm:$0xff] %vm760_vm2, %v758_v12 }
 0xb48   : > { %827 = vst.msk [vmem:[#allocation4] sm:$0xff] %vm826_vm3, %v824_v59 }
 0xb49   : > { %893 = vst.msk [vmem:[#allocation4] sm:$0xff] %vm892_vm4, %v890_v19 }
 0xb4b   : > { %v1303_v22 = vpop.permute.xlu0 %1302  ;;  %v1368_v53 = vpop.permute.xlu1 %1367 }
 0xb4d   : > { %v1730_v45 = vpop.f32.mrf.mxu3 }
 0xb4e   : > { %v1734_v50 = vmul.f32 %v2177_v44, %v1730_v45  ;;  %v999_v51 = vpop.permute.xlu2 %998  ;;  %v1795_v63 = vpop.f32.mrf.mxu2 }
 0xb4f   : > { %1002 = vst.msk [vmem:[#allocation4] sm:$0xff] %vm1001_vm5, %v999_v51 }
 0xb50   : > { %1067 = vst.msk [vmem:[#allocation4] sm:$0xff] %vm1066_vm6, %v1064_v43  ;;  %1736 = vrot.lane.b32.xlu0 %v1734_v50, %s2193_s16 }
 0xb51   : > { %1132 = vst.msk [vmem:[#allocation4] sm:$0xff] %vm1131_vm7, %v1129_v47 }
 0xb53   : > { %v1498_v7 = vpop.permute.xlu0 %1497 }
 0xb56   : > { %v1194_v52 = vpop.permute.xlu2 %1193 }
 0xb57   : > { %1197 = vst.msk [vmem:[#allocation4] sm:$0xff] %vm1196_vm8, %v1194_v52 }
 0xb58   : > { %1306 = vst.msk [vmem:[#allocation4] sm:$0xff] %vm1305_vm9, %v1303_v22 }
 0xb59   : > { %1371 = vst.msk [vmem:[#allocation4] sm:$0xff] %vm1370_vm10, %v1368_v53 }
 0xb5e   : > { %v1433_v4 = vpop.permute.xlu2 %1432 }
 0xb5f   : > { %1436 = vst.msk [vmem:[#allocation4] sm:$0xff] %vm1435_vm11, %v1433_v4 }
 0xb60   : > { %1501 = vst.msk [vmem:[#allocation4] sm:$0xff] %vm1500_vm12, %v1498_v7 }
 0xb66   : > { %v1672_v27 = vpop.permute.xlu2 %1671 }
 0xb76   : > { %v1774_v60 = vpop.xlane.xlu1 %1773 }
 0xb77   : > { %2178 = vrcp.f32 %v1774_v60 }
 0xb7d   : > { %v2179_v57 = vpop.eup %2178 }
 0xb7e   : > { %v1799_v0 = vmul.f32 %v2179_v57, %v1795_v63 }
 0xb80   : > { %1801 = vrot.lane.b32.xlu1 %v1799_v0, %s2191_s29 }
 0xb8e   : > { %v1607_v1 = vpop.permute.xlu1 %1606 }
 0xb8f   : > { %1610 = vst.msk [vmem:[#allocation4] sm:$0xff] %vm1609_vm13, %v1607_v1 }
 0xb90   : > { %1675 = vst.msk [vmem:[#allocation4] sm:$0xff] %vm1674_vm14, %v1672_v27 }
 0xbc2   : > { %v1737_v16 = vpop.permute.xlu0 %1736 }
 0xbc3   : > { %1740 = vst.msk [vmem:[#allocation4] sm:$0xff] %vm1739_vm15, %v1737_v16 }
 0xbf2   : > { %v1802_v11 = vpop.permute.xlu1 %1801 }
 0xbf3   : > { %1805 = vst.msk [vmem:[#allocation4] sm:$0xff] %vm1804_vm0, %v1802_v11 }
 0xbfa   : > { %v1806_v8 = vld [vmem:[#allocation4] sm:$0xff] }
 0xbfb   : > { %1843 = vmatmul.f32.vlgmr.msra.gmra.mxu3 %v1806_v8 }
 0xc7e   : > { %v1844_v18 = vpop.f32.mrf.mxu3 }
 0xc7f   : > { %v1845_v40 = vadd.f32 %v2115_v17, %v1844_v18 }
 0xc81   : > { %1847 = vst [vmem:[%s462_s22] sm:$0xff] %v1845_v40 }
 0xc82 PF: > { %s22_s21 = sadd.s32 1, %s2186_s21  }
 0xc83   : > { %p19_p4 = scmp.ge.s32.totalorder %s22_s21, 4  }
 0xc85   :  { %21 = sbr.rel (!%p19_p4) target bundleno = 1 (0x1), region = 110 }

</bundles_post_ra>
